<compile_context>
chip_gen: v7x
topology: tpu7x:2x2x1
jax: 0.10.0
libtpu: 0.0.40
codegen_flags: <defaults>
</compile_context>

<pallas_src>
import jax
import jax.numpy as jnp
from jax.experimental import pallas as pl
from jax.experimental.pallas import tpu as pltpu


# ----------------------------------------------------------------------------
# In-kernel building block: Conv3x3(pad=1) + folded-BN + ReLU + SE
# ----------------------------------------------------------------------------
def _conv3x3_bn_relu_se(x_hwc, pad_ref, w_ref, scale, shift, se_w1t, se_w2):
    """x_hwc:(Ho,Wo,Cin) value, pad_ref:(Ho+2,Wo+2,Cin) VMEM scratch,
    w_ref:(9,Cin,Cout) tap-major conv weights, scale/shift:(1,Cout),
    se_w1t:(Cr,Cout), se_w2:(Cr,Cout).  Returns (Ho*Wo, Cout)."""
    Ho, Wo, Cin = x_hwc.shape
    Cout = w_ref.shape[2]
    P = Ho * Wo

    # Zero-padded conv input lives in VMEM scratch (no HBM im2col).
    pad_ref[...] = jnp.zeros_like(pad_ref)
    pad_ref[1:Ho + 1, 1:Wo + 1, :] = x_hwc

    # Conv3x3 as 9 shifted (P, Cin) x (Cin, Cout) MXU dots, default precision.
    acc = jnp.zeros((P, Cout), jnp.float32)
    for k in range(9):
        dy, dx = divmod(k, 3)
        tap = pad_ref[dy:dy + Ho, dx:dx + Wo, :].reshape(P, Cin)
        acc = acc + jnp.dot(tap, w_ref[k], preferred_element_type=jnp.float32)

    # Folded conv-bias + BatchNorm(eval) + ReLU.
    a = jnp.maximum(acc * scale + shift, 0.0)                    # (P, Cout)

    # SE block entirely on VPU/XLU (no 1-row MXU dots):
    pooled = jnp.mean(a, axis=0, keepdims=True)                  # (1, Cout)
    z = jnp.sum(pooled * se_w1t, axis=1, keepdims=True)          # (Cr, 1)
    z = jnp.maximum(z, 0.0)
    t = jnp.sum(z * se_w2, axis=0, keepdims=True)                # (1, Cout)
    gate = 1.0 / (1.0 + jnp.exp(-t))                             # sigmoid
    return a * gate                                              # (P, Cout)


# ----------------------------------------------------------------------------
# Fused Down kernel: one batch element per grid step.
# ----------------------------------------------------------------------------
def _down_fused_kernel(xw_ref, w1_ref, sc1_ref, sh1_ref, se1a_ref, se1b_ref,
                       w2_ref, sc2_ref, sh2_ref, se2a_ref, se2b_ref,
                       o_ref, pad1_ref, pad2_ref):
    Ho = pad1_ref.shape[0] - 2
    Wo = pad1_ref.shape[1] - 2
    Cout = pad2_ref.shape[2]

    # Fused 2x2 max-pool: the 4 window taps were packed into the leading axis,
    # so the pool is just 3 elementwise maxima on the VPU.
    # TODO(synk): reading the raw NCHW tensor with strided in-kernel loads would
    # drop the one space-to-depth transpose the wrapper still does in XLA.
    xp = jnp.maximum(jnp.maximum(xw_ref[0], xw_ref[1]),
                     jnp.maximum(xw_ref[2], xw_ref[3]))          # (Ho, Wo, Cin)

    a1 = _conv3x3_bn_relu_se(xp, pad1_ref, w1_ref,
                             sc1_ref[...], sh1_ref[...],
                             se1a_ref[...], se1b_ref[...])       # (P, Cout)
    a2 = _conv3x3_bn_relu_se(a1.reshape(Ho, Wo, Cout), pad2_ref, w2_ref,
                             sc2_ref[...], sh2_ref[...],
                             se2a_ref[...], se2b_ref[...])       # (P, Cout)

    # Channel-major write -> wrapper returns NCHW with a free reshape, and the
    # store rows are 64 lanes wide (denser than Cout=32 masked stores).
    o_ref[0] = jnp.transpose(a2).astype(o_ref.dtype)             # (Cout, P)


# ----------------------------------------------------------------------------
# Down.forward
# ----------------------------------------------------------------------------
def _fold_bn(bias, gamma, beta, mean, var, eps=1e-5):
    scale = gamma / jnp.sqrt(var + eps)
    shift = (bias - mean) * scale + beta
    return scale, shift


def down_forward(x_nchw, p):
    N, Cin, H, W = x_nchw.shape
    Ho, Wo = H // 2, W // 2                    # MaxPool2d(2,2) floors odd sizes
    Cout = p["conv1_w"].shape[-1]
    Cr = p["se1_w1"].shape[-1]
    P = Ho * Wo

    # Glue: a single XLA transpose that folds NCHW->channels-last AND packs the
    # four 2x2 pooling taps into a leading axis (same total bytes as x).
    xc = x_nchw[:, :, :2 * Ho, :2 * Wo]
    xw = xc.reshape(N, Cin, Ho, 2, Wo, 2).transpose(0, 3, 5, 2, 4, 1)
    xw = xw.reshape(N * 4, Ho, Wo, Cin)        # tap k of batch n at row n*4 + k

    w1 = p["conv1_w"].reshape(9, Cin, Cout)    # (ky*3+kx, cin, cout)
    w2 = p["conv2_w"].reshape(9, Cout, Cout)
    s1, b1 = _fold_bn(p["bias1"], p["gamma1"], p["beta1"], p["mean1"], p["var1"])
    s2, b2 = _fold_bn(p["bias2"], p["gamma2"], p["beta2"], p["mean2"], p["var2"])

    out = pl.pallas_call(
        _down_fused_kernel,
        out_shape=jax.ShapeDtypeStruct((N, Cout, P), x_nchw.dtype),
        grid=(N,),
        in_specs=[
            pl.BlockSpec((4, Ho, Wo, Cin), lambda n: (n, 0, 0, 0)),
            pl.BlockSpec((9, Cin, Cout), lambda n: (0, 0, 0)),
            pl.BlockSpec((1, Cout), lambda n: (0, 0)),
            pl.BlockSpec((1, Cout), lambda n: (0, 0)),
            pl.BlockSpec((Cr, Cout), lambda n: (0, 0)),
            pl.BlockSpec((Cr, Cout), lambda n: (0, 0)),
            pl.BlockSpec((9, Cout, Cout), lambda n: (0, 0, 0)),
            pl.BlockSpec((1, Cout), lambda n: (0, 0)),
            pl.BlockSpec((1, Cout), lambda n: (0, 0)),
            pl.BlockSpec((Cr, Cout), lambda n: (0, 0)),
            pl.BlockSpec((Cr, Cout), lambda n: (0, 0)),
        ],
        out_specs=pl.BlockSpec((1, Cout, P), lambda n: (n, 0, 0)),
        scratch_shapes=[
            pltpu.VMEM((Ho + 2, Wo + 2, Cin), jnp.float32),
            pltpu.VMEM((Ho + 2, Wo + 2, Cout), jnp.float32),
        ],
        compiler_params=pltpu.CompilerParams(
            dimension_semantics=("parallel",),
            vmem_limit_bytes=32 * 1024 * 1024),
    )(xw, w1, s1.reshape(1, Cout), b1.reshape(1, Cout),
      jnp.transpose(p["se1_w1"]), p["se1_w2"],
      w2, s2.reshape(1, Cout), b2.reshape(1, Cout),
      jnp.transpose(p["se2_w1"]), p["se2_w2"])

    return out.reshape(N, Cout, Ho, Wo)        # free reshape -> NCHW


# ----------------------------------------------------------------------------
# Pure-JAX reference (XLA conv at HIGHEST precision) for correctness checking
# ----------------------------------------------------------------------------
def _ref_block(x, w, bias, gamma, beta, mean, var, se_w1, se_w2, eps=1e-5):
    y = jax.lax.conv_general_dilated(
        x, w, window_strides=(1, 1), padding="SAME",
        dimension_numbers=("NHWC", "HWIO", "NHWC"),
        precision=jax.lax.Precision.HIGHEST)
    y = y + bias
    y = (y - mean) / jnp.sqrt(var + eps) * gamma + beta
    y = jnp.maximum(y, 0.0)
    pooled = jnp.mean(y, axis=(1, 2))                            # (N, C)
    z = jnp.maximum(pooled @ se_w1, 0.0)
    s = jax.nn.sigmoid(z @ se_w2)
    return y * s[:, None, None, :]


def down_reference(x_nchw, p):
    x = jnp.transpose(x_nchw, (0, 2, 3, 1))
    N, H, W, C = x.shape
    x = x.reshape(N, H // 2, 2, W // 2, 2, C).max(axis=(2, 4))
    x = _ref_block(x, p["conv1_w"], p["bias1"], p["gamma1"], p["beta1"],
                   p["mean1"], p["var1"], p["se1_w1"], p["se1_w2"])
    x = _ref_block(x, p["conv2_w"], p["bias2"], p["gamma2"], p["beta2"],
                   p["mean2"], p["var2"], p["se2_w1"], p["se2_w2"])
    return jnp.transpose(x, (0, 3, 1, 2))


# ----------------------------------------------------------------------------
# main
# ----------------------------------------------------------------------------
if __name__ == "__main__":
    N, Cin, H, W = 2, 4, 16, 16
    Cout = 32
    Cr = Cout // 16  # SE reduction=16

    key = jax.random.PRNGKey(0)
    ks = jax.random.split(key, 20)

    params = {
        "conv1_w": 0.1 * jax.random.normal(ks[0], (3, 3, Cin, Cout), jnp.float32),
        "bias1":   0.1 * jax.random.normal(ks[1], (Cout,), jnp.float32),
        "gamma1":  1.0 + 0.1 * jax.random.normal(ks[2], (Cout,), jnp.float32),
        "beta1":   0.1 * jax.random.normal(ks[3], (Cout,), jnp.float32),
        "mean1":   0.1 * jax.random.normal(ks[4], (Cout,), jnp.float32),
        "var1":    0.5 + jnp.abs(jax.random.normal(ks[5], (Cout,), jnp.float32)),
        "se1_w1":  0.2 * jax.random.normal(ks[6], (Cout, Cr), jnp.float32),
        "se1_w2":  0.2 * jax.random.normal(ks[7], (Cr, Cout), jnp.float32),

        "conv2_w": 0.1 * jax.random.normal(ks[8], (3, 3, Cout, Cout), jnp.float32),
        "bias2":   0.1 * jax.random.normal(ks[9], (Cout,), jnp.float32),
        "gamma2":  1.0 + 0.1 * jax.random.normal(ks[10], (Cout,), jnp.float32),
        "beta2":   0.1 * jax.random.normal(ks[11], (Cout,), jnp.float32),
        "mean2":   0.1 * jax.random.normal(ks[12], (Cout,), jnp.float32),
        "var2":    0.5 + jnp.abs(jax.random.normal(ks[13], (Cout,), jnp.float32)),
        "se2_w1":  0.2 * jax.random.normal(ks[14], (Cout, Cr), jnp.float32),
        "se2_w2":  0.2 * jax.random.normal(ks[15], (Cr, Cout), jnp.float32),
    }

    x = jax.random.normal(ks[16], (N, Cin, H, W), jnp.float32)    # NCHW input

    out = jax.jit(down_forward)(x, params)
    out = jax.block_until_ready(out)

    ref = jax.block_until_ready(jax.jit(down_reference)(x, params))

    assert out.shape == (N, Cout, H // 2, W // 2), out.shape
    # Tolerance covers the default (non-HIGHEST) MXU precision in the kernel,
    # which may use bf16 passes, vs. the HIGHEST-precision f32 reference.
    assert jnp.allclose(out, ref, atol=2e-2, rtol=2e-2), (
        float(jnp.max(jnp.abs(out - ref))))

    print("KERNEL_OK")
</pallas_src>

<mosaic_0001>
module attributes {stable_mosaic.version = 11 : i64} {
  func.func @_down_fused_kernel(%arg0: i32, %arg1: memref<4x8x8x4xf32, #tpu.memory_space<vmem>>, %arg2: memref<9x4x32xf32, #tpu.memory_space<vmem>>, %arg3: memref<1x32xf32, #tpu.memory_space<vmem>>, %arg4: memref<1x32xf32, #tpu.memory_space<vmem>>, %arg5: memref<2x32xf32, #tpu.memory_space<vmem>>, %arg6: memref<2x32xf32, #tpu.memory_space<vmem>>, %arg7: memref<9x32x32xf32, #tpu.memory_space<vmem>>, %arg8: memref<1x32xf32, #tpu.memory_space<vmem>>, %arg9: memref<1x32xf32, #tpu.memory_space<vmem>>, %arg10: memref<2x32xf32, #tpu.memory_space<vmem>>, %arg11: memref<2x32xf32, #tpu.memory_space<vmem>>, %arg12: memref<1x32x64xf32, #tpu.memory_space<vmem>>, %arg13: memref<10x10x4xf32, #tpu.memory_space<vmem>>, %arg14: memref<10x10x32xf32, #tpu.memory_space<vmem>>) attributes {dimension_semantics = [#tpu.dimension_semantics<parallel>], iteration_bounds = array<i64: 2>, scalar_prefetch = 0 : i64, scratch_operands = 2 : i64, tpu.core_type = #tpu.core_type<tc>, window_params = [{transform_indices = @transform_0, window_bounds = array<i64: 4, 8, 8, 4>}, {pipeline_mode = #tpu.pipeline_mode<synchronous>, transform_indices = @transform_1, window_bounds = array<i64: 9, 4, 32>}, {pipeline_mode = #tpu.pipeline_mode<synchronous>, transform_indices = @transform_2, window_bounds = array<i64: 1, 32>}, {pipeline_mode = #tpu.pipeline_mode<synchronous>, transform_indices = @transform_3, window_bounds = array<i64: 1, 32>}, {pipeline_mode = #tpu.pipeline_mode<synchronous>, transform_indices = @transform_4, window_bounds = array<i64: 2, 32>}, {pipeline_mode = #tpu.pipeline_mode<synchronous>, transform_indices = @transform_5, window_bounds = array<i64: 2, 32>}, {pipeline_mode = #tpu.pipeline_mode<synchronous>, transform_indices = @transform_6, window_bounds = array<i64: 9, 32, 32>}, {pipeline_mode = #tpu.pipeline_mode<synchronous>, transform_indices = @transform_7, window_bounds = array<i64: 1, 32>}, {pipeline_mode = #tpu.pipeline_mode<synchronous>, transform_indices = @transform_8, window_bounds = array<i64: 1, 32>}, {pipeline_mode = #tpu.pipeline_mode<synchronous>, transform_indices = @transform_9, window_bounds = array<i64: 2, 32>}, {pipeline_mode = #tpu.pipeline_mode<synchronous>, transform_indices = @transform_10, window_bounds = array<i64: 2, 32>}, {transform_indices = @transform_11, window_bounds = array<i64: 1, 32, 64>}]} {
    %c0 = arith.constant 0 : index
    %c0_0 = arith.constant 0 : index
    %c0_1 = arith.constant 0 : index
    %c0_2 = arith.constant 0 : index
    %0 = vector.load %arg1[%c0, %c0_0, %c0_1, %c0_2] : memref<4x8x8x4xf32, #tpu.memory_space<vmem>>, vector<1x8x8x4xf32>
    %1 = vector.shape_cast %0 : vector<1x8x8x4xf32> to vector<8x8x4xf32>
    %c1 = arith.constant 1 : index
    %c0_3 = arith.constant 0 : index
    %c0_4 = arith.constant 0 : index
    %c0_5 = arith.constant 0 : index
    %2 = vector.load %arg1[%c1, %c0_3, %c0_4, %c0_5] : memref<4x8x8x4xf32, #tpu.memory_space<vmem>>, vector<1x8x8x4xf32>
    %3 = vector.shape_cast %2 : vector<1x8x8x4xf32> to vector<8x8x4xf32>
    %4 = arith.maximumf %1, %3 : vector<8x8x4xf32>
    %c2 = arith.constant 2 : index
    %c0_6 = arith.constant 0 : index
    %c0_7 = arith.constant 0 : index
    %c0_8 = arith.constant 0 : index
    %5 = vector.load %arg1[%c2, %c0_6, %c0_7, %c0_8] : memref<4x8x8x4xf32, #tpu.memory_space<vmem>>, vector<1x8x8x4xf32>
    %6 = vector.shape_cast %5 : vector<1x8x8x4xf32> to vector<8x8x4xf32>
    %c3 = arith.constant 3 : index
    %c0_9 = arith.constant 0 : index
    %c0_10 = arith.constant 0 : index
    %c0_11 = arith.constant 0 : index
    %7 = vector.load %arg1[%c3, %c0_9, %c0_10, %c0_11] : memref<4x8x8x4xf32, #tpu.memory_space<vmem>>, vector<1x8x8x4xf32>
    %8 = vector.shape_cast %7 : vector<1x8x8x4xf32> to vector<8x8x4xf32>
    %9 = arith.maximumf %6, %8 : vector<8x8x4xf32>
    %10 = arith.maximumf %4, %9 : vector<8x8x4xf32>
    %c0_12 = arith.constant 0 : index
    %c0_13 = arith.constant 0 : index
    %11 = vector.load %arg3[%c0_12, %c0_13] : memref<1x32xf32, #tpu.memory_space<vmem>>, vector<1x32xf32>
    %c0_14 = arith.constant 0 : index
    %c0_15 = arith.constant 0 : index
    %12 = vector.load %arg4[%c0_14, %c0_15] : memref<1x32xf32, #tpu.memory_space<vmem>>, vector<1x32xf32>
    %c0_16 = arith.constant 0 : index
    %c0_17 = arith.constant 0 : index
    %13 = vector.load %arg5[%c0_16, %c0_17] : memref<2x32xf32, #tpu.memory_space<vmem>>, vector<2x32xf32>
    %c0_18 = arith.constant 0 : index
    %c0_19 = arith.constant 0 : index
    %14 = vector.load %arg6[%c0_18, %c0_19] : memref<2x32xf32, #tpu.memory_space<vmem>>, vector<2x32xf32>
    %cst = arith.constant 0.000000e+00 : f32
    %15 = vector.broadcast %cst : f32 to vector<10x10x4xf32>
    %c0_20 = arith.constant 0 : index
    %c0_21 = arith.constant 0 : index
    %c0_22 = arith.constant 0 : index
    %16 = vector.load %arg13[%c0_20, %c0_21, %c0_22] : memref<10x10x4xf32, #tpu.memory_space<vmem>>, vector<10x10x4xf32>
    tpu.vector_store %arg13[%c0_20, %c0_21, %c0_22], %15 {strides = array<i32>} : memref<10x10x4xf32, #tpu.memory_space<vmem>>, vector<10x10x4xf32>,
    %c1_23 = arith.constant 1 : index
    %c1_24 = arith.constant 1 : index
    %c0_25 = arith.constant 0 : index
    %17 = vector.load %arg13[%c1_23, %c1_24, %c0_25] : memref<10x10x4xf32, #tpu.memory_space<vmem>>, vector<8x8x4xf32>
    tpu.vector_store %arg13[%c1_23, %c1_24, %c0_25], %10 {strides = array<i32>} : memref<10x10x4xf32, #tpu.memory_space<vmem>>, vector<8x8x4xf32>,
    %cst_26 = arith.constant 0.000000e+00 : f32
    %18 = vector.broadcast %cst_26 : f32 to vector<64x32xf32>
    %c0_27 = arith.constant 0 : index
    %c0_28 = arith.constant 0 : index
    %c0_29 = arith.constant 0 : index
    %19 = vector.load %arg13[%c0_27, %c0_28, %c0_29] : memref<10x10x4xf32, #tpu.memory_space<vmem>>, vector<8x8x4xf32>
    %20 = vector.shape_cast %19 : vector<8x8x4xf32> to vector<64x4xf32>
    %c0_30 = arith.constant 0 : index
    %c0_31 = arith.constant 0 : index
    %c0_32 = arith.constant 0 : index
    %21 = vector.load %arg2[%c0_30, %c0_31, %c0_32] : memref<9x4x32xf32, #tpu.memory_space<vmem>>, vector<1x4x32xf32>
    %22 = vector.shape_cast %21 : vector<1x4x32xf32> to vector<4x32xf32>
    %cst_33 = arith.constant dense<0.000000e+00> : vector<64x32xf32>
    %23 = tpu.matmul %20, %22, %cst_33 {dimension_numbers = #tpu.dot_dimension_numbers<[1], [0], [0], [1], [0, 0, 1, 1], [], []>} : vector<64x4xf32>, vector<4x32xf32>, vector<64x32xf32> -> vector<64x32xf32>
    %24 = arith.addf %18, %23 : vector<64x32xf32>
    %c0_34 = arith.constant 0 : index
    %c1_35 = arith.constant 1 : index
    %c0_36 = arith.constant 0 : index
    %25 = vector.load %arg13[%c0_34, %c1_35, %c0_36] : memref<10x10x4xf32, #tpu.memory_space<vmem>>, vector<8x8x4xf32>
    %26 = vector.shape_cast %25 : vector<8x8x4xf32> to vector<64x4xf32>
    %c1_37 = arith.constant 1 : index
    %c0_38 = arith.constant 0 : index
    %c0_39 = arith.constant 0 : index
    %27 = vector.load %arg2[%c1_37, %c0_38, %c0_39] : memref<9x4x32xf32, #tpu.memory_space<vmem>>, vector<1x4x32xf32>
    %28 = vector.shape_cast %27 : vector<1x4x32xf32> to vector<4x32xf32>
    %cst_40 = arith.constant dense<0.000000e+00> : vector<64x32xf32>
    %29 = tpu.matmul %26, %28, %cst_40 {dimension_numbers = #tpu.dot_dimension_numbers<[1], [0], [0], [1], [0, 0, 1, 1], [], []>} : vector<64x4xf32>, vector<4x32xf32>, vector<64x32xf32> -> vector<64x32xf32>
    %30 = arith.addf %24, %29 : vector<64x32xf32>
    %c0_41 = arith.constant 0 : index
    %c2_42 = arith.constant 2 : index
    %c0_43 = arith.constant 0 : index
    %31 = vector.load %arg13[%c0_41, %c2_42, %c0_43] : memref<10x10x4xf32, #tpu.memory_space<vmem>>, vector<8x8x4xf32>
    %32 = vector.shape_cast %31 : vector<8x8x4xf32> to vector<64x4xf32>
    %c2_44 = arith.constant 2 : index
    %c0_45 = arith.constant 0 : index
    %c0_46 = arith.constant 0 : index
    %33 = vector.load %arg2[%c2_44, %c0_45, %c0_46] : memref<9x4x32xf32, #tpu.memory_space<vmem>>, vector<1x4x32xf32>
    %34 = vector.shape_cast %33 : vector<1x4x32xf32> to vector<4x32xf32>
    %cst_47 = arith.constant dense<0.000000e+00> : vector<64x32xf32>
    %35 = tpu.matmul %32, %34, %cst_47 {dimension_numbers = #tpu.dot_dimension_numbers<[1], [0], [0], [1], [0, 0, 1, 1], [], []>} : vector<64x4xf32>, vector<4x32xf32>, vector<64x32xf32> -> vector<64x32xf32>
    %36 = arith.addf %30, %35 : vector<64x32xf32>
    %c1_48 = arith.constant 1 : index
    %c0_49 = arith.constant 0 : index
    %c0_50 = arith.constant 0 : index
    %37 = vector.load %arg13[%c1_48, %c0_49, %c0_50] : memref<10x10x4xf32, #tpu.memory_space<vmem>>, vector<8x8x4xf32>
    %38 = vector.shape_cast %37 : vector<8x8x4xf32> to vector<64x4xf32>
    %c3_51 = arith.constant 3 : index
    %c0_52 = arith.constant 0 : index
    %c0_53 = arith.constant 0 : index
    %39 = vector.load %arg2[%c3_51, %c0_52, %c0_53] : memref<9x4x32xf32, #tpu.memory_space<vmem>>, vector<1x4x32xf32>
    %40 = vector.shape_cast %39 : vector<1x4x32xf32> to vector<4x32xf32>
    %cst_54 = arith.constant dense<0.000000e+00> : vector<64x32xf32>
    %41 = tpu.matmul %38, %40, %cst_54 {dimension_numbers = #tpu.dot_dimension_numbers<[1], [0], [0], [1], [0, 0, 1, 1], [], []>} : vector<64x4xf32>, vector<4x32xf32>, vector<64x32xf32> -> vector<64x32xf32>
    %42 = arith.addf %36, %41 : vector<64x32xf32>
    %c1_55 = arith.constant 1 : index
    %c1_56 = arith.constant 1 : index
    %c0_57 = arith.constant 0 : index
    %43 = vector.load %arg13[%c1_55, %c1_56, %c0_57] : memref<10x10x4xf32, #tpu.memory_space<vmem>>, vector<8x8x4xf32>
    %44 = vector.shape_cast %43 : vector<8x8x4xf32> to vector<64x4xf32>
    %c4 = arith.constant 4 : index
    %c0_58 = arith.constant 0 : index
    %c0_59 = arith.constant 0 : index
    %45 = vector.load %arg2[%c4, %c0_58, %c0_59] : memref<9x4x32xf32, #tpu.memory_space<vmem>>, vector<1x4x32xf32>
    %46 = vector.shape_cast %45 : vector<1x4x32xf32> to vector<4x32xf32>
    %cst_60 = arith.constant dense<0.000000e+00> : vector<64x32xf32>
    %47 = tpu.matmul %44, %46, %cst_60 {dimension_numbers = #tpu.dot_dimension_numbers<[1], [0], [0], [1], [0, 0, 1, 1], [], []>} : vector<64x4xf32>, vector<4x32xf32>, vector<64x32xf32> -> vector<64x32xf32>
    %48 = arith.addf %42, %47 : vector<64x32xf32>
    %c1_61 = arith.constant 1 : index
    %c2_62 = arith.constant 2 : index
    %c0_63 = arith.constant 0 : index
    %49 = vector.load %arg13[%c1_61, %c2_62, %c0_63] : memref<10x10x4xf32, #tpu.memory_space<vmem>>, vector<8x8x4xf32>
    %50 = vector.shape_cast %49 : vector<8x8x4xf32> to vector<64x4xf32>
    %c5 = arith.constant 5 : index
    %c0_64 = arith.constant 0 : index
    %c0_65 = arith.constant 0 : index
    %51 = vector.load %arg2[%c5, %c0_64, %c0_65] : memref<9x4x32xf32, #tpu.memory_space<vmem>>, vector<1x4x32xf32>
    %52 = vector.shape_cast %51 : vector<1x4x32xf32> to vector<4x32xf32>
    %cst_66 = arith.constant dense<0.000000e+00> : vector<64x32xf32>
    %53 = tpu.matmul %50, %52, %cst_66 {dimension_numbers = #tpu.dot_dimension_numbers<[1], [0], [0], [1], [0, 0, 1, 1], [], []>} : vector<64x4xf32>, vector<4x32xf32>, vector<64x32xf32> -> vector<64x32xf32>
    %54 = arith.addf %48, %53 : vector<64x32xf32>
    %c2_67 = arith.constant 2 : index
    %c0_68 = arith.constant 0 : index
    %c0_69 = arith.constant 0 : index
    %55 = vector.load %arg13[%c2_67, %c0_68, %c0_69] : memref<10x10x4xf32, #tpu.memory_space<vmem>>, vector<8x8x4xf32>
    %56 = vector.shape_cast %55 : vector<8x8x4xf32> to vector<64x4xf32>
    %c6 = arith.constant 6 : index
    %c0_70 = arith.constant 0 : index
    %c0_71 = arith.constant 0 : index
    %57 = vector.load %arg2[%c6, %c0_70, %c0_71] : memref<9x4x32xf32, #tpu.memory_space<vmem>>, vector<1x4x32xf32>
    %58 = vector.shape_cast %57 : vector<1x4x32xf32> to vector<4x32xf32>
    %cst_72 = arith.constant dense<0.000000e+00> : vector<64x32xf32>
    %59 = tpu.matmul %56, %58, %cst_72 {dimension_numbers = #tpu.dot_dimension_numbers<[1], [0], [0], [1], [0, 0, 1, 1], [], []>} : vector<64x4xf32>, vector<4x32xf32>, vector<64x32xf32> -> vector<64x32xf32>
    %60 = arith.addf %54, %59 : vector<64x32xf32>
    %c2_73 = arith.constant 2 : index
    %c1_74 = arith.constant 1 : index
    %c0_75 = arith.constant 0 : index
    %61 = vector.load %arg13[%c2_73, %c1_74, %c0_75] : memref<10x10x4xf32, #tpu.memory_space<vmem>>, vector<8x8x4xf32>
    %62 = vector.shape_cast %61 : vector<8x8x4xf32> to vector<64x4xf32>
    %c7 = arith.constant 7 : index
    %c0_76 = arith.constant 0 : index
    %c0_77 = arith.constant 0 : index
    %63 = vector.load %arg2[%c7, %c0_76, %c0_77] : memref<9x4x32xf32, #tpu.memory_space<vmem>>, vector<1x4x32xf32>
    %64 = vector.shape_cast %63 : vector<1x4x32xf32> to vector<4x32xf32>
    %cst_78 = arith.constant dense<0.000000e+00> : vector<64x32xf32>
    %65 = tpu.matmul %62, %64, %cst_78 {dimension_numbers = #tpu.dot_dimension_numbers<[1], [0], [0], [1], [0, 0, 1, 1], [], []>} : vector<64x4xf32>, vector<4x32xf32>, vector<64x32xf32> -> vector<64x32xf32>
    %66 = arith.addf %60, %65 : vector<64x32xf32>
    %c2_79 = arith.constant 2 : index
    %c2_80 = arith.constant 2 : index
    %c0_81 = arith.constant 0 : index
    %67 = vector.load %arg13[%c2_79, %c2_80, %c0_81] : memref<10x10x4xf32, #tpu.memory_space<vmem>>, vector<8x8x4xf32>
    %68 = vector.shape_cast %67 : vector<8x8x4xf32> to vector<64x4xf32>
    %c8 = arith.constant 8 : index
    %c0_82 = arith.constant 0 : index
    %c0_83 = arith.constant 0 : index
    %69 = vector.load %arg2[%c8, %c0_82, %c0_83] : memref<9x4x32xf32, #tpu.memory_space<vmem>>, vector<1x4x32xf32>
    %70 = vector.shape_cast %69 : vector<1x4x32xf32> to vector<4x32xf32>
    %cst_84 = arith.constant dense<0.000000e+00> : vector<64x32xf32>
    %71 = tpu.matmul %68, %70, %cst_84 {dimension_numbers = #tpu.dot_dimension_numbers<[1], [0], [0], [1], [0, 0, 1, 1], [], []>} : vector<64x4xf32>, vector<4x32xf32>, vector<64x32xf32> -> vector<64x32xf32>
    %72 = arith.addf %66, %71 : vector<64x32xf32>
    %73 = vector.broadcast %11 : vector<1x32xf32> to vector<64x32xf32>
    %74 = arith.mulf %72, %73 : vector<64x32xf32>
    %75 = vector.broadcast %12 : vector<1x32xf32> to vector<64x32xf32>
    %76 = arith.addf %74, %75 : vector<64x32xf32>
    %cst_85 = arith.constant 0.000000e+00 : f32
    %77 = vector.broadcast %cst_85 : f32 to vector<64x32xf32>
    %78 = arith.maximumf %76, %77 : vector<64x32xf32>
    %cst_86 = arith.constant dense<0.000000e+00> : vector<32xf32>
    %79 = vector.multi_reduction <add>, %78, %cst_86 [0] : vector<64x32xf32> to vector<32xf32>
    %80 = vector.shape_cast %79 : vector<32xf32> to vector<1x32xf32>
    %cst_87 = arith.constant 6.400000e+01 : f32
    %81 = vector.broadcast %cst_87 : f32 to vector<1x32xf32>
    %82 = arith.divf %80, %81 : vector<1x32xf32>
    %83 = vector.broadcast %82 : vector<1x32xf32> to vector<2x32xf32>
    %84 = arith.mulf %83, %13 : vector<2x32xf32>
    %cst_88 = arith.constant dense<0.000000e+00> : vector<2xf32>
    %85 = vector.multi_reduction <add>, %84, %cst_88 [1] : vector<2x32xf32> to vector<2xf32>
    %86 = vector.shape_cast %85 : vector<2xf32> to vector<2x1xf32>
    %cst_89 = arith.constant 0.000000e+00 : f32
    %87 = vector.broadcast %cst_89 : f32 to vector<2x1xf32>
    %88 = arith.maximumf %86, %87 : vector<2x1xf32>
    %89 = vector.broadcast %88 : vector<2x1xf32> to vector<2x32xf32>
    %90 = arith.mulf %89, %14 : vector<2x32xf32>
    %cst_90 = arith.constant dense<0.000000e+00> : vector<32xf32>
    %91 = vector.multi_reduction <add>, %90, %cst_90 [0] : vector<2x32xf32> to vector<32xf32>
    %92 = vector.shape_cast %91 : vector<32xf32> to vector<1x32xf32>
    %cst_91 = arith.constant 0.000000e+00 : f32
    %93 = vector.broadcast %cst_91 : f32 to vector<1x32xf32>
    %94 = arith.subf %93, %92 : vector<1x32xf32>
    %95 = math.exp %94 : vector<1x32xf32>
    %cst_92 = arith.constant 1.000000e+00 : f32
    %96 = vector.broadcast %cst_92 : f32 to vector<1x32xf32>
    %97 = arith.addf %96, %95 : vector<1x32xf32>
    %cst_93 = arith.constant 1.000000e+00 : f32
    %98 = vector.broadcast %cst_93 : f32 to vector<1x32xf32>
    %99 = arith.divf %98, %97 : vector<1x32xf32>
    %100 = vector.broadcast %99 : vector<1x32xf32> to vector<64x32xf32>
    %101 = arith.mulf %78, %100 : vector<64x32xf32>
    %102 = vector.shape_cast %101 : vector<64x32xf32> to vector<8x8x32xf32>
    %c0_94 = arith.constant 0 : index
    %c0_95 = arith.constant 0 : index
    %103 = vector.load %arg8[%c0_94, %c0_95] : memref<1x32xf32, #tpu.memory_space<vmem>>, vector<1x32xf32>
    %c0_96 = arith.constant 0 : index
    %c0_97 = arith.constant 0 : index
    %104 = vector.load %arg9[%c0_96, %c0_97] : memref<1x32xf32, #tpu.memory_space<vmem>>, vector<1x32xf32>
    %c0_98 = arith.constant 0 : index
    %c0_99 = arith.constant 0 : index
    %105 = vector.load %arg10[%c0_98, %c0_99] : memref<2x32xf32, #tpu.memory_space<vmem>>, vector<2x32xf32>
    %c0_100 = arith.constant 0 : index
    %c0_101 = arith.constant 0 : index
    %106 = vector.load %arg11[%c0_100, %c0_101] : memref<2x32xf32, #tpu.memory_space<vmem>>, vector<2x32xf32>
    %cst_102 = arith.constant 0.000000e+00 : f32
    %107 = vector.broadcast %cst_102 : f32 to vector<10x10x32xf32>
    %c0_103 = arith.constant 0 : index
    %c0_104 = arith.constant 0 : index
    %c0_105 = arith.constant 0 : index
    %108 = vector.load %arg14[%c0_103, %c0_104, %c0_105] : memref<10x10x32xf32, #tpu.memory_space<vmem>>, vector<10x10x32xf32>
    tpu.vector_store %arg14[%c0_103, %c0_104, %c0_105], %107 {strides = array<i32>} : memref<10x10x32xf32, #tpu.memory_space<vmem>>, vector<10x10x32xf32>,
    %c1_106 = arith.constant 1 : index
    %c1_107 = arith.constant 1 : index
    %c0_108 = arith.constant 0 : index
    %109 = vector.load %arg14[%c1_106, %c1_107, %c0_108] : memref<10x10x32xf32, #tpu.memory_space<vmem>>, vector<8x8x32xf32>
    tpu.vector_store %arg14[%c1_106, %c1_107, %c0_108], %102 {strides = array<i32>} : memref<10x10x32xf32, #tpu.memory_space<vmem>>, vector<8x8x32xf32>,
    %cst_109 = arith.constant 0.000000e+00 : f32
    %110 = vector.broadcast %cst_109 : f32 to vector<64x32xf32>
    %c0_110 = arith.constant 0 : index
    %c0_111 = arith.constant 0 : index
    %c0_112 = arith.constant 0 : index
    %111 = vector.load %arg14[%c0_110, %c0_111, %c0_112] : memref<10x10x32xf32, #tpu.memory_space<vmem>>, vector<8x8x32xf32>
    %112 = vector.shape_cast %111 : vector<8x8x32xf32> to vector<64x32xf32>
    %c0_113 = arith.constant 0 : index
    %c0_114 = arith.constant 0 : index
    %c0_115 = arith.constant 0 : index
    %113 = vector.load %arg7[%c0_113, %c0_114, %c0_115] : memref<9x32x32xf32, #tpu.memory_space<vmem>>, vector<1x32x32xf32>
    %114 = vector.shape_cast %113 : vector<1x32x32xf32> to vector<32x32xf32>
    %cst_116 = arith.constant dense<0.000000e+00> : vector<64x32xf32>
    %115 = tpu.matmul %112, %114, %cst_116 {dimension_numbers = #tpu.dot_dimension_numbers<[1], [0], [0], [1], [0, 0, 1, 1], [], []>} : vector<64x32xf32>, vector<32x32xf32>, vector<64x32xf32> -> vector<64x32xf32>
    %116 = arith.addf %110, %115 : vector<64x32xf32>
    %c0_117 = arith.constant 0 : index
    %c1_118 = arith.constant 1 : index
    %c0_119 = arith.constant 0 : index
    %117 = vector.load %arg14[%c0_117, %c1_118, %c0_119] : memref<10x10x32xf32, #tpu.memory_space<vmem>>, vector<8x8x32xf32>
    %118 = vector.shape_cast %117 : vector<8x8x32xf32> to vector<64x32xf32>
    %c1_120 = arith.constant 1 : index
    %c0_121 = arith.constant 0 : index
    %c0_122 = arith.constant 0 : index
    %119 = vector.load %arg7[%c1_120, %c0_121, %c0_122] : memref<9x32x32xf32, #tpu.memory_space<vmem>>, vector<1x32x32xf32>
    %120 = vector.shape_cast %119 : vector<1x32x32xf32> to vector<32x32xf32>
    %cst_123 = arith.constant dense<0.000000e+00> : vector<64x32xf32>
    %121 = tpu.matmul %118, %120, %cst_123 {dimension_numbers = #tpu.dot_dimension_numbers<[1], [0], [0], [1], [0, 0, 1, 1], [], []>} : vector<64x32xf32>, vector<32x32xf32>, vector<64x32xf32> -> vector<64x32xf32>
    %122 = arith.addf %116, %121 : vector<64x32xf32>
    %c0_124 = arith.constant 0 : index
    %c2_125 = arith.constant 2 : index
    %c0_126 = arith.constant 0 : index
    %123 = vector.load %arg14[%c0_124, %c2_125, %c0_126] : memref<10x10x32xf32, #tpu.memory_space<vmem>>, vector<8x8x32xf32>
    %124 = vector.shape_cast %123 : vector<8x8x32xf32> to vector<64x32xf32>
    %c2_127 = arith.constant 2 : index
    %c0_128 = arith.constant 0 : index
    %c0_129 = arith.constant 0 : index
    %125 = vector.load %arg7[%c2_127, %c0_128, %c0_129] : memref<9x32x32xf32, #tpu.memory_space<vmem>>, vector<1x32x32xf32>
    %126 = vector.shape_cast %125 : vector<1x32x32xf32> to vector<32x32xf32>
    %cst_130 = arith.constant dense<0.000000e+00> : vector<64x32xf32>
    %127 = tpu.matmul %124, %126, %cst_130 {dimension_numbers = #tpu.dot_dimension_numbers<[1], [0], [0], [1], [0, 0, 1, 1], [], []>} : vector<64x32xf32>, vector<32x32xf32>, vector<64x32xf32> -> vector<64x32xf32>
    %128 = arith.addf %122, %127 : vector<64x32xf32>
    %c1_131 = arith.constant 1 : index
    %c0_132 = arith.constant 0 : index
    %c0_133 = arith.constant 0 : index
    %129 = vector.load %arg14[%c1_131, %c0_132, %c0_133] : memref<10x10x32xf32, #tpu.memory_space<vmem>>, vector<8x8x32xf32>
    %130 = vector.shape_cast %129 : vector<8x8x32xf32> to vector<64x32xf32>
    %c3_134 = arith.constant 3 : index
    %c0_135 = arith.constant 0 : index
    %c0_136 = arith.constant 0 : index
    %131 = vector.load %arg7[%c3_134, %c0_135, %c0_136] : memref<9x32x32xf32, #tpu.memory_space<vmem>>, vector<1x32x32xf32>
    %132 = vector.shape_cast %131 : vector<1x32x32xf32> to vector<32x32xf32>
    %cst_137 = arith.constant dense<0.000000e+00> : vector<64x32xf32>
    %133 = tpu.matmul %130, %132, %cst_137 {dimension_numbers = #tpu.dot_dimension_numbers<[1], [0], [0], [1], [0, 0, 1, 1], [], []>} : vector<64x32xf32>, vector<32x32xf32>, vector<64x32xf32> -> vector<64x32xf32>
    %134 = arith.addf %128, %133 : vector<64x32xf32>
    %c1_138 = arith.constant 1 : index
    %c1_139 = arith.constant 1 : index
    %c0_140 = arith.constant 0 : index
    %135 = vector.load %arg14[%c1_138, %c1_139, %c0_140] : memref<10x10x32xf32, #tpu.memory_space<vmem>>, vector<8x8x32xf32>
    %136 = vector.shape_cast %135 : vector<8x8x32xf32> to vector<64x32xf32>
    %c4_141 = arith.constant 4 : index
    %c0_142 = arith.constant 0 : index
    %c0_143 = arith.constant 0 : index
    %137 = vector.load %arg7[%c4_141, %c0_142, %c0_143] : memref<9x32x32xf32, #tpu.memory_space<vmem>>, vector<1x32x32xf32>
    %138 = vector.shape_cast %137 : vector<1x32x32xf32> to vector<32x32xf32>
    %cst_144 = arith.constant dense<0.000000e+00> : vector<64x32xf32>
    %139 = tpu.matmul %136, %138, %cst_144 {dimension_numbers = #tpu.dot_dimension_numbers<[1], [0], [0], [1], [0, 0, 1, 1], [], []>} : vector<64x32xf32>, vector<32x32xf32>, vector<64x32xf32> -> vector<64x32xf32>
    %140 = arith.addf %134, %139 : vector<64x32xf32>
    %c1_145 = arith.constant 1 : index
    %c2_146 = arith.constant 2 : index
    %c0_147 = arith.constant 0 : index
    %141 = vector.load %arg14[%c1_145, %c2_146, %c0_147] : memref<10x10x32xf32, #tpu.memory_space<vmem>>, vector<8x8x32xf32>
    %142 = vector.shape_cast %141 : vector<8x8x32xf32> to vector<64x32xf32>
    %c5_148 = arith.constant 5 : index
    %c0_149 = arith.constant 0 : index
    %c0_150 = arith.constant 0 : index
    %143 = vector.load %arg7[%c5_148, %c0_149, %c0_150] : memref<9x32x32xf32, #tpu.memory_space<vmem>>, vector<1x32x32xf32>
    %144 = vector.shape_cast %143 : vector<1x32x32xf32> to vector<32x32xf32>
    %cst_151 = arith.constant dense<0.000000e+00> : vector<64x32xf32>
    %145 = tpu.matmul %142, %144, %cst_151 {dimension_numbers = #tpu.dot_dimension_numbers<[1], [0], [0], [1], [0, 0, 1, 1], [], []>} : vector<64x32xf32>, vector<32x32xf32>, vector<64x32xf32> -> vector<64x32xf32>
    %146 = arith.addf %140, %145 : vector<64x32xf32>
    %c2_152 = arith.constant 2 : index
    %c0_153 = arith.constant 0 : index
    %c0_154 = arith.constant 0 : index
    %147 = vector.load %arg14[%c2_152, %c0_153, %c0_154] : memref<10x10x32xf32, #tpu.memory_space<vmem>>, vector<8x8x32xf32>
    %148 = vector.shape_cast %147 : vector<8x8x32xf32> to vector<64x32xf32>
    %c6_155 = arith.constant 6 : index
    %c0_156 = arith.constant 0 : index
    %c0_157 = arith.constant 0 : index
    %149 = vector.load %arg7[%c6_155, %c0_156, %c0_157] : memref<9x32x32xf32, #tpu.memory_space<vmem>>, vector<1x32x32xf32>
    %150 = vector.shape_cast %149 : vector<1x32x32xf32> to vector<32x32xf32>
    %cst_158 = arith.constant dense<0.000000e+00> : vector<64x32xf32>
    %151 = tpu.matmul %148, %150, %cst_158 {dimension_numbers = #tpu.dot_dimension_numbers<[1], [0], [0], [1], [0, 0, 1, 1], [], []>} : vector<64x32xf32>, vector<32x32xf32>, vector<64x32xf32> -> vector<64x32xf32>
    %152 = arith.addf %146, %151 : vector<64x32xf32>
    %c2_159 = arith.constant 2 : index
    %c1_160 = arith.constant 1 : index
    %c0_161 = arith.constant 0 : index
    %153 = vector.load %arg14[%c2_159, %c1_160, %c0_161] : memref<10x10x32xf32, #tpu.memory_space<vmem>>, vector<8x8x32xf32>
    %154 = vector.shape_cast %153 : vector<8x8x32xf32> to vector<64x32xf32>
    %c7_162 = arith.constant 7 : index
    %c0_163 = arith.constant 0 : index
    %c0_164 = arith.constant 0 : index
    %155 = vector.load %arg7[%c7_162, %c0_163, %c0_164] : memref<9x32x32xf32, #tpu.memory_space<vmem>>, vector<1x32x32xf32>
    %156 = vector.shape_cast %155 : vector<1x32x32xf32> to vector<32x32xf32>
    %cst_165 = arith.constant dense<0.000000e+00> : vector<64x32xf32>
    %157 = tpu.matmul %154, %156, %cst_165 {dimension_numbers = #tpu.dot_dimension_numbers<[1], [0], [0], [1], [0, 0, 1, 1], [], []>} : vector<64x32xf32>, vector<32x32xf32>, vector<64x32xf32> -> vector<64x32xf32>
    %158 = arith.addf %152, %157 : vector<64x32xf32>
    %c2_166 = arith.constant 2 : index
    %c2_167 = arith.constant 2 : index
    %c0_168 = arith.constant 0 : index
    %159 = vector.load %arg14[%c2_166, %c2_167, %c0_168] : memref<10x10x32xf32, #tpu.memory_space<vmem>>, vector<8x8x32xf32>
    %160 = vector.shape_cast %159 : vector<8x8x32xf32> to vector<64x32xf32>
    %c8_169 = arith.constant 8 : index
    %c0_170 = arith.constant 0 : index
    %c0_171 = arith.constant 0 : index
    %161 = vector.load %arg7[%c8_169, %c0_170, %c0_171] : memref<9x32x32xf32, #tpu.memory_space<vmem>>, vector<1x32x32xf32>
    %162 = vector.shape_cast %161 : vector<1x32x32xf32> to vector<32x32xf32>
    %cst_172 = arith.constant dense<0.000000e+00> : vector<64x32xf32>
    %163 = tpu.matmul %160, %162, %cst_172 {dimension_numbers = #tpu.dot_dimension_numbers<[1], [0], [0], [1], [0, 0, 1, 1], [], []>} : vector<64x32xf32>, vector<32x32xf32>, vector<64x32xf32> -> vector<64x32xf32>
    %164 = arith.addf %158, %163 : vector<64x32xf32>
    %165 = vector.broadcast %103 : vector<1x32xf32> to vector<64x32xf32>
    %166 = arith.mulf %164, %165 : vector<64x32xf32>
    %167 = vector.broadcast %104 : vector<1x32xf32> to vector<64x32xf32>
    %168 = arith.addf %166, %167 : vector<64x32xf32>
    %cst_173 = arith.constant 0.000000e+00 : f32
    %169 = vector.broadcast %cst_173 : f32 to vector<64x32xf32>
    %170 = arith.maximumf %168, %169 : vector<64x32xf32>
    %cst_174 = arith.constant dense<0.000000e+00> : vector<32xf32>
    %171 = vector.multi_reduction <add>, %170, %cst_174 [0] : vector<64x32xf32> to vector<32xf32>
    %172 = vector.shape_cast %171 : vector<32xf32> to vector<1x32xf32>
    %cst_175 = arith.constant 6.400000e+01 : f32
    %173 = vector.broadcast %cst_175 : f32 to vector<1x32xf32>
    %174 = arith.divf %172, %173 : vector<1x32xf32>
    %175 = vector.broadcast %174 : vector<1x32xf32> to vector<2x32xf32>
    %176 = arith.mulf %175, %105 : vector<2x32xf32>
    %cst_176 = arith.constant dense<0.000000e+00> : vector<2xf32>
    %177 = vector.multi_reduction <add>, %176, %cst_176 [1] : vector<2x32xf32> to vector<2xf32>
    %178 = vector.shape_cast %177 : vector<2xf32> to vector<2x1xf32>
    %cst_177 = arith.constant 0.000000e+00 : f32
    %179 = vector.broadcast %cst_177 : f32 to vector<2x1xf32>
    %180 = arith.maximumf %178, %179 : vector<2x1xf32>
    %181 = vector.broadcast %180 : vector<2x1xf32> to vector<2x32xf32>
    %182 = arith.mulf %181, %106 : vector<2x32xf32>
    %cst_178 = arith.constant dense<0.000000e+00> : vector<32xf32>
    %183 = vector.multi_reduction <add>, %182, %cst_178 [0] : vector<2x32xf32> to vector<32xf32>
    %184 = vector.shape_cast %183 : vector<32xf32> to vector<1x32xf32>
    %cst_179 = arith.constant 0.000000e+00 : f32
    %185 = vector.broadcast %cst_179 : f32 to vector<1x32xf32>
    %186 = arith.subf %185, %184 : vector<1x32xf32>
    %187 = math.exp %186 : vector<1x32xf32>
    %cst_180 = arith.constant 1.000000e+00 : f32
    %188 = vector.broadcast %cst_180 : f32 to vector<1x32xf32>
    %189 = arith.addf %188, %187 : vector<1x32xf32>
    %cst_181 = arith.constant 1.000000e+00 : f32
    %190 = vector.broadcast %cst_181 : f32 to vector<1x32xf32>
    %191 = arith.divf %190, %189 : vector<1x32xf32>
    %192 = vector.broadcast %191 : vector<1x32xf32> to vector<64x32xf32>
    %193 = arith.mulf %170, %192 : vector<64x32xf32>
    %194 = tpu.transpose %193, [1, 0] : vector<64x32xf32> -> vector<32x64xf32>
    %c0_182 = arith.constant 0 : index
    %c0_183 = arith.constant 0 : index
    %c0_184 = arith.constant 0 : index
    %195 = vector.load %arg12[%c0_182, %c0_183, %c0_184] : memref<1x32x64xf32, #tpu.memory_space<vmem>>, vector<1x32x64xf32>
    %196 = vector.shape_cast %195 : vector<1x32x64xf32> to vector<32x64xf32>
    %197 = vector.shape_cast %194 : vector<32x64xf32> to vector<1x32x64xf32>
    tpu.vector_store %arg12[%c0_182, %c0_183, %c0_184], %197 {strides = array<i32>} : memref<1x32x64xf32, #tpu.memory_space<vmem>>, vector<1x32x64xf32>,
    return
  }
  func.func @transform_0(%arg0: i32) -> (i32, i32, i32, i32) {
    %c0_i32 = arith.constant 0 : i32
    %c0_i32_0 = arith.constant 0 : i32
    %c0_i32_1 = arith.constant 0 : i32
    %c0_i32_2 = arith.constant 0 : i32
    return %arg0, %c0_i32, %c0_i32_0, %c0_i32_1 : i32, i32, i32, i32
  }
  func.func @transform_1(%arg0: i32) -> (i32, i32, i32) {
    %c0_i32 = arith.constant 0 : i32
    %c0_i32_0 = arith.constant 0 : i32
    %c0_i32_1 = arith.constant 0 : i32
    %c0_i32_2 = arith.constant 0 : i32
    return %c0_i32, %c0_i32_0, %c0_i32_1 : i32, i32, i32
  }
  func.func @transform_2(%arg0: i32) -> (i32, i32) {
    %c0_i32 = arith.constant 0 : i32
    %c0_i32_0 = arith.constant 0 : i32
    %c0_i32_1 = arith.constant 0 : i32
    return %c0_i32, %c0_i32_0 : i32, i32
  }
  func.func @transform_3(%arg0: i32) -> (i32, i32) {
    %c0_i32 = arith.constant 0 : i32
    %c0_i32_0 = arith.constant 0 : i32
    %c0_i32_1 = arith.constant 0 : i32
    return %c0_i32, %c0_i32_0 : i32, i32
  }
  func.func @transform_4(%arg0: i32) -> (i32, i32) {
    %c0_i32 = arith.constant 0 : i32
    %c0_i32_0 = arith.constant 0 : i32
    %c0_i32_1 = arith.constant 0 : i32
    return %c0_i32, %c0_i32_0 : i32, i32
  }
  func.func @transform_5(%arg0: i32) -> (i32, i32) {
    %c0_i32 = arith.constant 0 : i32
    %c0_i32_0 = arith.constant 0 : i32
    %c0_i32_1 = arith.constant 0 : i32
    return %c0_i32, %c0_i32_0 : i32, i32
  }
  func.func @transform_6(%arg0: i32) -> (i32, i32, i32) {
    %c0_i32 = arith.constant 0 : i32
    %c0_i32_0 = arith.constant 0 : i32
    %c0_i32_1 = arith.constant 0 : i32
    %c0_i32_2 = arith.constant 0 : i32
    return %c0_i32, %c0_i32_0, %c0_i32_1 : i32, i32, i32
  }
  func.func @transform_7(%arg0: i32) -> (i32, i32) {
    %c0_i32 = arith.constant 0 : i32
    %c0_i32_0 = arith.constant 0 : i32
    %c0_i32_1 = arith.constant 0 : i32
    return %c0_i32, %c0_i32_0 : i32, i32
  }
  func.func @transform_8(%arg0: i32) -> (i32, i32) {
    %c0_i32 = arith.constant 0 : i32
    %c0_i32_0 = arith.constant 0 : i32
    %c0_i32_1 = arith.constant 0 : i32
    return %c0_i32, %c0_i32_0 : i32, i32
  }
  func.func @transform_9(%arg0: i32) -> (i32, i32) {
    %c0_i32 = arith.constant 0 : i32
    %c0_i32_0 = arith.constant 0 : i32
    %c0_i32_1 = arith.constant 0 : i32
    return %c0_i32, %c0_i32_0 : i32, i32
  }
  func.func @transform_10(%arg0: i32) -> (i32, i32) {
    %c0_i32 = arith.constant 0 : i32
    %c0_i32_0 = arith.constant 0 : i32
    %c0_i32_1 = arith.constant 0 : i32
    return %c0_i32, %c0_i32_0 : i32, i32
  }
  func.func @transform_11(%arg0: i32) -> (i32, i32, i32) {
    %c0_i32 = arith.constant 0 : i32
    %c0_i32_0 = arith.constant 0 : i32
    %c0_i32_1 = arith.constant 0 : i32
    return %arg0, %c0_i32, %c0_i32_0 : i32, i32, i32
  }
}

</mosaic_0001>

<bundles_post_ra>
// kernel: down_forward.1
= control target key start
LH: loop header
LB: loop body
LE: loop exit
PB: predicated region body
PF: predicated region fallthrough
CT: control target
= control target key end

     0   :  { %s4469_s17 = smov 0   ;;  %s5226_s0 = inlined_call_operand.vmem [shape: f32[8,8,8,4], index: 0, kind: input, shape index: {}]   ;;  %s5227_s1 = inlined_call_operand.vmem [shape: f32[9,4,32], index: 1, kind: input, shape index: {}]   ;;  %s5228_s2 = inlined_call_operand.vmem [shape: f32[1,32], index: 2, kind: input, shape index: {}]   ;;  %s5229_s3 = inlined_call_operand.vmem [shape: f32[1,32], index: 3, kind: input, shape index: {}]   ;;  %s5230_s4 = inlined_call_operand.vmem [shape: f32[2,32], index: 4, kind: input, shape index: {}]   ;;  %s5231_s5 = inlined_call_operand.vmem [shape: f32[2,32], index: 5, kind: input, shape index: {}]   ;;  %s5232_s6 = inlined_call_operand.vmem [shape: f32[9,32,32], index: 6, kind: input, shape index: {}]   ;;  %s5233_s7 = inlined_call_operand.vmem [shape: f32[1,32], index: 7, kind: input, shape index: {}]   ;;  %s5234_s8 = inlined_call_operand.vmem [shape: f32[1,32], index: 8, kind: input, shape index: {}]   ;;  %s5235_s9 = inlined_call_operand.vmem [shape: f32[2,32], index: 9, kind: input, shape index: {}]   ;;  %s5236_s10 = inlined_call_operand.vmem [shape: f32[2,32], index: 10, kind: input, shape index: {}]   ;;  %s5237_s11 = inlined_call_operand.vmem [shape: f32[2,32,64], index: 11, kind: output, shape index: {}]  }
   0x1 LB: > { %s4475_s18 = sadd.s32 4294967295, %s4406_s17   ;;  %p3457_p0 = scmp.ge.s32.totalorder %s4406_s17, 1  ;;  %s4406_s17 = sphi %s4469_s17, %s21_s17  }
   0x2   : > { %p339_p1 = scmp.lt.s32.totalorder %s4406_s17, 3 }
   0x4   : > { %p340_p2 = pnand %p3457_p0, %p339_p1 }
   0x5   : > { %v3487_v0 = vld [vmem:[%s5227_s1 + $0x4] sm:$0xf] (!%p340_p2)  ;;  %vm529_vm0 = vcmask (!%p340_p2), 1043456   ;;  %vm455_vm1 = vcmask (!%p340_p2), 31744   ;;  %vm457_vm2 = vcmask (!%p340_p2), 25600   ;;  %v4408_v1 = vmov (!%p340_p2), 0.0  }
   0x6   : > { %343 = sbr.rel (%p340_p2) target bundleno = 1322 (0x52a), region = 64  ;;  %3877 = vmatprep.subr.msk.mxu0 (!%p340_p2), %vm529_vm0, %v3487_v0  ;;  %456 = vst.msk [vmem:[#allocation2] sm:$0xff] (!%p340_p2), %vm455_vm1, %v4408_v1  ;;  %459 = vst.msk [vmem:[#allocation2 + $0x10] sm:$0xff] (!%p340_p2), %vm455_vm1, %v4408_v1  ;;  %v4526_v2 = vld [vmem:[%s5227_s1] sm:$0xf] (!%p340_p2)  ;;  %s3458_s23 = sshll.u32 (!%p340_p2), %s4475_s18, 2 }
   0x7   : > { %458 = vst.msk [vmem:[#allocation2 + $0x8] sm:$0x3] (!%p340_p2), %vm457_vm2, %v4408_v1  ;;  %460 = vst.msk [vmem:[#allocation2 + $0x18] sm:$0x3] (!%p340_p2), %vm457_vm2, %v4408_v1  ;;  %3878 = vmatpush3.msk.msra.mxu0 (!%p340_p2), %vm529_vm0, %v3487_v0  ;;  %p381_p3 = scmp.lt.s32.totalorder (!%p340_p2), %s3458_s23, 7  ;;  %vm1857_vm3 = vcmask (!%p340_p2), 261120  }
   0x8   : > { %461 = vst.msk [vmem:[#allocation2 + $0x20] sm:$0xff] (!%p340_p2), %vm455_vm1, %v4408_v1  ;;  %463 = vst.msk [vmem:[#allocation2 + $0x30] sm:$0xff] (!%p340_p2), %vm455_vm1, %v4408_v1  ;;  %3891 = vmatprep.subr.msk.mxu0 (!%p340_p2), %vm529_vm0, %v4526_v2  ;;  %v3506_v60 = vld [vmem:[%s5227_s1 + $0x8] sm:$0xf] (!%p340_p2)  ;;  %vm1882_vm4 = vcmask (!%p340_p2), 254976   ;;  %p387_p4 = scmp.lt.s32.totalorder (!%p340_p2), %s4475_s18, 1 }
   0x9   : > { %462 = vst.msk [vmem:[#allocation2 + $0x28] sm:$0x3] (!%p340_p2), %vm457_vm2, %v4408_v1  ;;  %464 = vst.msk [vmem:[#allocation2 + $0x38] sm:$0x3] (!%p340_p2), %vm457_vm2, %v4408_v1  ;;  %vm3393_vm5 = vcmask (!%p340_p2), 523264  }
   0xa   : > { %465 = vst.msk [vmem:[#allocation2 + $0x40] sm:$0xff] (!%p340_p2), %vm455_vm1, %v4408_v1  ;;  %467 = vst.msk [vmem:[#allocation2 + $0x50] sm:$0xff] (!%p340_p2), %vm455_vm1, %v4408_v1 }
   0xb   : > { %466 = vst.msk [vmem:[#allocation2 + $0x48] sm:$0x3] (!%p340_p2), %vm457_vm2, %v4408_v1  ;;  %468 = vst.msk [vmem:[#allocation2 + $0x58] sm:$0x3] (!%p340_p2), %vm457_vm2, %v4408_v1 }
   0xc   : > { %469 = vst.msk [vmem:[#allocation2 + $0x60] sm:$0xff] (!%p340_p2), %vm455_vm1, %v4408_v1  ;;  %471 = vst.msk [vmem:[#allocation2 + $0x70] sm:$0xff] (!%p340_p2), %vm455_vm1, %v4408_v1 }
   0xd   : > { %470 = vst.msk [vmem:[#allocation2 + $0x68] sm:$0x3] %vm457_vm2, %v4408_v1  ;;  %472 = vst.msk [vmem:[#allocation2 + $0x78] sm:$0x3] %vm457_vm2, %v4408_v1  ;;  %s5239_s23 = smov (!%p381_p3, %s3458_s23), 7  ;;  %s5241_s18 = smov (!%p387_p4, %s4475_s18), 1 }
   0xe   : > { %473 = vst.msk [vmem:[#allocation2 + $0x80] sm:$0xff] %vm455_vm1, %v4408_v1  ;;  %475 = vst.msk [vmem:[#allocation2 + $0x90] sm:$0xff] %vm455_vm1, %v4408_v1  ;;  %s3686_s24 = sshll.u32 %s5239_s23, 6  ;;  %v495_v3 = vld [vmem:[#allocation2 + $0x1] sm:$0xff]  ;;  %s3687_s28 = sshll.u32 %s5241_s18, 5 }
   0xf   : > { %474 = vst.msk [vmem:[#allocation2 + $0x88] sm:$0x3] %vm457_vm2, %v4408_v1  ;;  %476 = vst.msk [vmem:[#allocation2 + $0x98] sm:$0x3] %vm457_vm2, %v4408_v1  ;;  %s4535_s27 = scalar_lea.vmem %s5226_s0, %s3686_s24  ;;  %3879 = vmatprep.mubr.msk.f32.mxu0 %vm455_vm1, %v495_v3  ;;  %s391_s12 = scalar_lea.vmem %s5237_s11, %s3687_s28 }
  0x10   : > { %v392_v4 = vld [vmem:[%s4535_s27] sm:$0xff]  ;;  %v393_v9 = vld [vmem:[%s4535_s27 + $0x8] sm:$0xff]  ;;  %v394_v16 = vld [vmem:[%s4535_s27 + $0x10] sm:$0xff]  ;;  %1913 = vst.msk [vmem:[#allocation3] sm:$0xff] %vm1857_vm3, %v4408_v1 }
  0x11   : > { %v3463_v5 = vld [vmem:[%s4535_s27 + $0x40] sm:$0xff]  ;;  %v3464_v11 = vld [vmem:[%s4535_s27 + $0x48] sm:$0xff]  ;;  %v3465_v17 = vld [vmem:[%s4535_s27 + $0x50] sm:$0xff]  ;;  %1915 = vst.msk [vmem:[#allocation3 + $0x10] sm:$0xff] %vm1857_vm3, %v4408_v1 }
  0x12   : > { %v409_v6 = vmax.f32 %v392_v4, %v3463_v5  ;;  %v3471_v7 = vld [vmem:[%s4535_s27 + $0x80] sm:$0xff]  ;;  %v3472_v12 = vld [vmem:[%s4535_s27 + $0x88] sm:$0xff]  ;;  %v410_v14 = vmax.f32 %v393_v9, %v3464_v11  ;;  %v3473_v18 = vld [vmem:[%s4535_s27 + $0x90] sm:$0xff]  ;;  %v411_v20 = vmax.f32 %v394_v16, %v3465_v17  ;;  %1917 = vst.msk [vmem:[#allocation3 + $0x20] sm:$0xff] %vm1857_vm3, %v4408_v1 }
  0x13   : > { %v3479_v8 = vld [vmem:[%s4535_s27 + $0xc0] sm:$0xff]  ;;  %v3480_v13 = vld [vmem:[%s4535_s27 + $0xc8] sm:$0xff]  ;;  %v3481_v21 = vld [vmem:[%s4535_s27 + $0xd0] sm:$0xff]  ;;  %1919 = vst.msk [vmem:[#allocation3 + $0x30] sm:$0xff] %vm1857_vm3, %v4408_v1 }
  0x14   : > { %v435_v10 = vmax.f32 %v3471_v7, %v3479_v8  ;;  %v436_v15 = vmax.f32 %v3472_v12, %v3480_v13  ;;  %v395_v22 = vld [vmem:[%s4535_s27 + $0x18] sm:$0xff]  ;;  %v437_v25 = vmax.f32 %v3473_v18, %v3481_v21  ;;  %v396_v29 = vld [vmem:[%s4535_s27 + $0x20] sm:$0xff]  ;;  %v397_v37 = vld [vmem:[%s4535_s27 + $0x28] sm:$0xff]  ;;  %1921 = vst.msk [vmem:[#allocation3 + $0x40] sm:$0xff] %vm1857_vm3, %v4408_v1 }
  0x15   : > { %v3466_v23 = vld [vmem:[%s4535_s27 + $0x58] sm:$0xff]  ;;  %v3467_v31 = vld [vmem:[%s4535_s27 + $0x60] sm:$0xff]  ;;  %v3468_v38 = vld [vmem:[%s4535_s27 + $0x68] sm:$0xff]  ;;  %1923 = vst.msk [vmem:[#allocation3 + $0x50] sm:$0xff] %vm1857_vm3, %v4408_v1 }
  0x16   : > { %v443_v19 = vmax.f32 %v409_v6, %v435_v10  ;;  %v444_v24 = vmax.f32 %v410_v14, %v436_v15  ;;  %v412_v26 = vmax.f32 %v395_v22, %v3466_v23  ;;  %v3474_v27 = vld [vmem:[%s4535_s27 + $0x98] sm:$0xff]  ;;  %v3475_v32 = vld [vmem:[%s4535_s27 + $0xa0] sm:$0xff]  ;;  %v445_v34 = vmax.f32 %v411_v20, %v437_v25  ;;  %v3476_v39 = vld [vmem:[%s4535_s27 + $0xa8] sm:$0xff]  ;;  %1925 = vst.msk [vmem:[#allocation3 + $0x60] sm:$0xff] %vm1857_vm3, %v4408_v1 }
  0x17   : > { %v3482_v28 = vld [vmem:[%s4535_s27 + $0xd8] sm:$0xff]  ;;  %v3483_v33 = vld [vmem:[%s4535_s27 + $0xe0] sm:$0xff]  ;;  %v413_v35 = vmax.f32 %v396_v29, %v3467_v31  ;;  %v414_v41 = vmax.f32 %v397_v37, %v3468_v38  ;;  %v3484_v42 = vld [vmem:[%s4535_s27 + $0xe8] sm:$0xff]  ;;  %1927 = vst.msk [vmem:[#allocation3 + $0x70] sm:$0xff] %vm1857_vm3, %v4408_v1 }
  0x18   : > { %478 = vst.msk [vmem:[#allocation2 + $0x11] sm:$0xff] %vm455_vm1, %v443_v19  ;;  %v438_v30 = vmax.f32 %v3474_v27, %v3482_v28  ;;  %479 = vst.msk [vmem:[#allocation2 + $0x21] sm:$0xff] %vm455_vm1, %v444_v24  ;;  %v439_v36 = vmax.f32 %v3475_v32, %v3483_v33  ;;  %v398_v43 = vld [vmem:[%s4535_s27 + $0x30] sm:$0xff]  ;;  %v440_v46 = vmax.f32 %v3476_v39, %v3484_v42  ;;  %v399_v51 = vld [vmem:[%s4535_s27 + $0x38] sm:$0xff] }
  0x19   : > { %v3469_v44 = vld [vmem:[%s4535_s27 + $0x70] sm:$0xff]  ;;  %480 = vst.msk [vmem:[#allocation2 + $0x31] sm:$0xff] %vm455_vm1, %v445_v34  ;;  %v3470_v52 = vld [vmem:[%s4535_s27 + $0x78] sm:$0xff]  ;;  %v486_v5 = vld [vmem:[#allocation2] sm:$0xff] }
  0x1a   : > { %v446_v40 = vmax.f32 %v412_v26, %v438_v30  ;;  %v447_v45 = vmax.f32 %v413_v35, %v439_v36  ;;  %v415_v47 = vmax.f32 %v398_v43, %v3469_v44  ;;  %v3477_v48 = vld [vmem:[%s4535_s27 + $0xb0] sm:$0xff]  ;;  %v448_v53 = vmax.f32 %v414_v41, %v440_v46  ;;  %v3478_v55 = vld [vmem:[%s4535_s27 + $0xb8] sm:$0xff]  ;;  %v3516_v8 = vld [vmem:[%s5227_s1 + $0xc] sm:$0xf]  ;;  %1929 = vst.msk [vmem:[#allocation3 + $0x80] sm:$0xff] %vm1857_vm3, %v4408_v1 }
  0x1b   : > { %v3485_v49 = vld [vmem:[%s4535_s27 + $0xf0] sm:$0xff]  ;;  %v416_v54 = vmax.f32 %v399_v51, %v3470_v52  ;;  %v3486_v56 = vld [vmem:[%s4535_s27 + $0xf8] sm:$0xff]  ;;  %v770_v14 = vld [vmem:[#allocation2 + $0x2] sm:$0xff]  ;;  %1931 = vst.msk [vmem:[#allocation3 + $0x90] sm:$0xff] %vm1857_vm3, %v4408_v1 }
  0x1c   : > { %481 = vst.msk [vmem:[#allocation2 + $0x41] sm:$0xff] %vm455_vm1, %v446_v40  ;;  %v441_v50 = vmax.f32 %v3477_v48, %v3485_v49  ;;  %482 = vst.msk [vmem:[#allocation2 + $0x51] sm:$0xff] %vm455_vm1, %v447_v45  ;;  %v442_v58 = vmax.f32 %v3478_v55, %v3486_v56  ;;  %v3526_v17 = vld [vmem:[%s5227_s1 + $0x10] sm:$0xf]  ;;  %v3536_v23 = vld [vmem:[%s5227_s1 + $0x14] sm:$0xf] }
  0x1d   : > { %483 = vst.msk [vmem:[#allocation2 + $0x61] sm:$0xff] %vm455_vm1, %v448_v53  ;;  %v3546_v25 = vld [vmem:[%s5227_s1 + $0x18] sm:$0xf]  ;;  %v3556_v27 = vld [vmem:[%s5227_s1 + $0x1c] sm:$0xf]  ;;  %v1378_v30 = vld [vmem:[#allocation2 + $0x90] sm:$0xff] }
  0x1e   : > { %v449_v57 = vmax.f32 %v415_v47, %v441_v50  ;;  %v450_v62 = vmax.f32 %v416_v54, %v442_v58  ;;  %v3566_v29 = vld [vmem:[%s5227_s1 + $0x20] sm:$0xf]  ;;  %v1528_v31 = vld [vmem:[#allocation2 + $0x91] sm:$0xff]  ;;  %1914 = vst.msk [vmem:[#allocation3 + $0x8] sm:$0x3] %vm1882_vm4, %v4408_v1 }
  0x1f   : > { %v4575_v59 = vld [vmem:[#allocation2 + $0x11] sm:$0xff]  ;;  %v4583_v61 = vld [vmem:[#allocation2 + $0x21] sm:$0xff]  ;;  %1916 = vst.msk [vmem:[#allocation3 + $0x18] sm:$0x3] %vm1882_vm4, %v4408_v1  ;;  %1918 = vst.msk [vmem:[#allocation3 + $0x28] sm:$0x3] %vm1882_vm4, %v4408_v1 }
  0x20   : > { %3880 = vmatmul.mubr.msk.f32.vlgmr.msra.gmra.mrb[0].mxu0 %vm455_vm1, %v4575_v59  ;;  %484 = vst.msk [vmem:[#allocation2 + $0x71] sm:$0xff] %vm455_vm1, %v449_v57  ;;  %v4590_v63 = vld [vmem:[#allocation2 + $0x31] sm:$0xff]  ;;  %485 = vst.msk [vmem:[#allocation2 + $0x81] sm:$0xff] %vm455_vm1, %v450_v62  ;;  %v4613_v7 = vld [vmem:[#allocation2 + $0x20] sm:$0xff] }
  0x21   : > { %3892 = vmatpush3.msk.msra.mxu0 %vm529_vm0, %v4526_v2  ;;  %3882 = vmatprep.mubr.msk.f32.mxu0 %vm455_vm1, %v4583_v61  ;;  %v487_v6 = vld [vmem:[#allocation2 + $0x10] sm:$0xff]  ;;  %v4644_v16 = vld [vmem:[#allocation2 + $0x22] sm:$0xff]  ;;  %1920 = vst.msk [vmem:[#allocation3 + $0x38] sm:$0x3] %vm1882_vm4, %v4408_v1  ;;  %1922 = vst.msk [vmem:[#allocation3 + $0x48] sm:$0x3] %vm1882_vm4, %v4408_v1 }
  0x22   : > { %3905 = vmatprep.subr.msk.mxu0 %vm529_vm0, %v3506_v60  ;;  %v4622_v9 = vld [vmem:[#allocation2 + $0x30] sm:$0xff]  ;;  %1924 = vst.msk [vmem:[#allocation3 + $0x58] sm:$0x3] %vm1882_vm4, %v4408_v1  ;;  %1926 = vst.msk [vmem:[#allocation3 + $0x68] sm:$0x3] %vm1882_vm4, %v4408_v1 }
  0x23   : > { %v4594_v0 = vld [vmem:[#allocation2 + $0x41] sm:$0xff]  ;;  %v4600_v3 = vld [vmem:[#allocation2 + $0x51] sm:$0xff]  ;;  %1928 = vst.msk [vmem:[#allocation3 + $0x78] sm:$0x3] %vm1882_vm4, %v4408_v1  ;;  %1930 = vst.msk [vmem:[#allocation3 + $0x88] sm:$0x3] %vm1882_vm4, %v4408_v1 }
  0x24   : > { %3883 = vmatmul.mubr.msk.f32.gmra.mrb[2].mxu0 %vm455_vm1, %v4590_v63  ;;  %v4602_v2 = vld [vmem:[#allocation2 + $0x61] sm:$0xff]  ;;  %v4631_v11 = vld [vmem:[#allocation2 + $0x50] sm:$0xff]  ;;  %1932 = vst.msk [vmem:[#allocation3 + $0x98] sm:$0x3] %vm1882_vm4, %v4408_v1  ;;  %v3576_v33 = vld [vmem:[%s5228_s2] ss:$0 sm:$0xff] }
  0x25   : > { %3885 = vmatprep.mubr.msk.f32.mxu0 %vm455_vm1, %v4594_v0  ;;  %v4624_v10 = vld [vmem:[#allocation2 + $0x40] sm:$0xff]  ;;  %v771_v15 = vld [vmem:[#allocation2 + $0x12] sm:$0xff] }
  0x26   : > { %v4633_v12 = vld [vmem:[#allocation2 + $0x60] sm:$0xff]  ;;  %v4653_v18 = vld [vmem:[#allocation2 + $0x32] sm:$0xff] }
  0x27   : > { %v4608_v4 = vld [vmem:[#allocation2 + $0x71] sm:$0xff]  ;;  %v4655_v19 = vld [vmem:[#allocation2 + $0x42] sm:$0xff]  ;;  %v3577_v34 = vld [vmem:[%s5229_s3] ss:$0 sm:$0xff] }
  0x28   : > { %3886 = vmatmul.mubr.msk.f32.gmra.mrb[4].mxu0 %vm455_vm1, %v4600_v3  ;;  %v4639_v13 = vld [vmem:[#allocation2 + $0x70] sm:$0xff]  ;;  %v4664_v21 = vld [vmem:[#allocation2 + $0x62] sm:$0xff] }
  0x29   : > { %3888 = vmatprep.mubr.msk.f32.mxu0 %vm455_vm1, %v4602_v2  ;;  %v4662_v20 = vld [vmem:[#allocation2 + $0x52] sm:$0xff]  ;;  %v927_v24 = vld [vmem:[#allocation2 + $0x80] sm:$0xff] }
  0x2a   : > { %v4670_v22 = vld [vmem:[#allocation2 + $0x72] sm:$0xff]  ;;  %v1077_v26 = vld [vmem:[#allocation2 + $0x81] sm:$0xff] }
  0x2b   : > { %v1227_v28 = vld [vmem:[#allocation2 + $0x82] sm:$0xff]  ;;  %v1678_v32 = vld [vmem:[#allocation2 + $0x92] sm:$0xff] }
  0x2c   : > { %3889 = vmatmul.mubr.msk.f32.gmra.mrb[6].mxu0 %vm455_vm1, %v4608_v4 }
  0x2d   : > { %3893 = vmatprep.mubr.msk.f32.mxu0 %vm455_vm1, %v486_v5 }
  0x30   : > { %3894 = vmatmul.mubr.msk.f32.vlgmr.msra.gmra.mrb[0].mxu0 %vm455_vm1, %v487_v6 }
  0x31   : > { %3906 = vmatpush3.msk.msra.mxu0 %vm529_vm0, %v3506_v60  ;;  %3896 = vmatprep.mubr.msk.f32.mxu0 %vm455_vm1, %v4613_v7 }
  0x32   : > { %3919 = vmatprep.subr.msk.mxu0 %vm529_vm0, %v3516_v8 }
  0x34   : > { %3897 = vmatmul.mubr.msk.f32.gmra.mrb[2].mxu0 %vm455_vm1, %v4622_v9 }
  0x35   : > { %3899 = vmatprep.mubr.msk.f32.mxu0 %vm455_vm1, %v4624_v10 }
  0x38   : > { %3900 = vmatmul.mubr.msk.f32.gmra.mrb[4].mxu0 %vm455_vm1, %v4631_v11 }
  0x39   : > { %3902 = vmatprep.mubr.msk.f32.mxu0 %vm455_vm1, %v4633_v12 }
  0x3c   : > { %3903 = vmatmul.mubr.msk.f32.gmra.mrb[6].mxu0 %vm455_vm1, %v4639_v13 }
  0x3d   : > { %3907 = vmatprep.mubr.msk.f32.mxu0 %vm455_vm1, %v770_v14 }
  0x40   : > { %3908 = vmatmul.mubr.msk.f32.vlgmr.msra.gmra.mrb[0].mxu0 %vm455_vm1, %v771_v15 }
  0x41   : > { %3920 = vmatpush3.msk.msra.mxu0 %vm529_vm0, %v3516_v8  ;;  %3910 = vmatprep.mubr.msk.f32.mxu0 %vm455_vm1, %v4644_v16 }
  0x42   : > { %3933 = vmatprep.subr.msk.mxu0 %vm529_vm0, %v3526_v17 }
  0x44   : > { %3911 = vmatmul.mubr.msk.f32.gmra.mrb[2].mxu0 %vm455_vm1, %v4653_v18 }
  0x45   : > { %3913 = vmatprep.mubr.msk.f32.mxu0 %vm455_vm1, %v4655_v19 }
  0x48   : > { %3914 = vmatmul.mubr.msk.f32.gmra.mrb[4].mxu0 %vm455_vm1, %v4662_v20 }
  0x49   : > { %3916 = vmatprep.mubr.msk.f32.mxu0 %vm455_vm1, %v4664_v21 }
  0x4c   : > { %3917 = vmatmul.mubr.msk.f32.gmra.mrb[6].mxu0 %vm455_vm1, %v4670_v22 }
  0x4d   : > { %3921 = vmatprep.mubr.msk.f32.mxu0 %vm455_vm1, %v487_v6 }
  0x50   : > { %3922 = vmatmul.mubr.msk.f32.vlgmr.msra.gmra.mrb[0].mxu0 %vm455_vm1, %v4613_v7 }
  0x51   : > { %3934 = vmatpush3.msk.msra.mxu0 %vm529_vm0, %v3526_v17  ;;  %3924 = vmatprep.mubr.msk.f32.mxu0 %vm455_vm1, %v4622_v9 }
  0x52   : > { %3947 = vmatprep.subr.msk.mxu0 %vm529_vm0, %v3536_v23 }
  0x54   : > { %3925 = vmatmul.mubr.msk.f32.gmra.mrb[2].mxu0 %vm455_vm1, %v4624_v10 }
  0x55   : > { %3927 = vmatprep.mubr.msk.f32.mxu0 %vm455_vm1, %v4631_v11 }
  0x58   : > { %3928 = vmatmul.mubr.msk.f32.gmra.mrb[4].mxu0 %vm455_vm1, %v4633_v12 }
  0x59   : > { %3930 = vmatprep.mubr.msk.f32.mxu0 %vm455_vm1, %v4639_v13 }
  0x5c   : > { %3931 = vmatmul.mubr.msk.f32.gmra.mrb[6].mxu0 %vm455_vm1, %v927_v24 }
  0x5d   : > { %3935 = vmatprep.mubr.msk.f32.mxu0 %vm455_vm1, %v4575_v59 }
  0x60   : > { %3936 = vmatmul.mubr.msk.f32.vlgmr.msra.gmra.mrb[0].mxu0 %vm455_vm1, %v4583_v61 }
  0x61   : > { %3948 = vmatpush3.msk.msra.mxu0 %vm529_vm0, %v3536_v23  ;;  %3938 = vmatprep.mubr.msk.f32.mxu0 %vm455_vm1, %v4590_v63 }
  0x62   : > { %3961 = vmatprep.subr.msk.mxu0 %vm529_vm0, %v3546_v25 }
  0x64   : > { %3939 = vmatmul.mubr.msk.f32.gmra.mrb[2].mxu0 %vm455_vm1, %v4594_v0 }
  0x65   : > { %3941 = vmatprep.mubr.msk.f32.mxu0 %vm455_vm1, %v4600_v3 }
  0x68   : > { %3942 = vmatmul.mubr.msk.f32.gmra.mrb[4].mxu0 %vm455_vm1, %v4602_v2 }
  0x69   : > { %3944 = vmatprep.mubr.msk.f32.mxu0 %vm455_vm1, %v4608_v4 }
  0x6c   : > { %3945 = vmatmul.mubr.msk.f32.gmra.mrb[6].mxu0 %vm455_vm1, %v1077_v26 }
  0x6d   : > { %3949 = vmatprep.mubr.msk.f32.mxu0 %vm455_vm1, %v771_v15 }
  0x70   : > { %3950 = vmatmul.mubr.msk.f32.vlgmr.msra.gmra.mrb[0].mxu0 %vm455_vm1, %v4644_v16 }
  0x71   : > { %3962 = vmatpush3.msk.msra.mxu0 %vm529_vm0, %v3546_v25  ;;  %3952 = vmatprep.mubr.msk.f32.mxu0 %vm455_vm1, %v4653_v18 }
  0x72   : > { %3975 = vmatprep.subr.msk.mxu0 %vm529_vm0, %v3556_v27 }
  0x74   : > { %3953 = vmatmul.mubr.msk.f32.gmra.mrb[2].mxu0 %vm455_vm1, %v4655_v19 }
  0x75   : > { %3955 = vmatprep.mubr.msk.f32.mxu0 %vm455_vm1, %v4662_v20 }
  0x78   : > { %3956 = vmatmul.mubr.msk.f32.gmra.mrb[4].mxu0 %vm455_vm1, %v4664_v21 }
  0x79   : > { %3958 = vmatprep.mubr.msk.f32.mxu0 %vm455_vm1, %v4670_v22 }
  0x7c   : > { %3959 = vmatmul.mubr.msk.f32.gmra.mrb[6].mxu0 %vm455_vm1, %v1227_v28 }
  0x7d   : > { %3963 = vmatprep.mubr.msk.f32.mxu0 %vm455_vm1, %v4613_v7 }
  0x80   : > { %3964 = vmatmul.mubr.msk.f32.vlgmr.msra.gmra.mrb[0].mxu0 %vm455_vm1, %v4622_v9 }
  0x81   : > { %3976 = vmatpush3.msk.msra.mxu0 %vm529_vm0, %v3556_v27  ;;  %3966 = vmatprep.mubr.msk.f32.mxu0 %vm455_vm1, %v4624_v10 }
  0x82   : > { %3989 = vmatprep.subr.msk.mxu0 %vm529_vm0, %v3566_v29 }
  0x84   : > { %3967 = vmatmul.mubr.msk.f32.gmra.mrb[2].mxu0 %vm455_vm1, %v4631_v11 }
  0x85   : > { %3969 = vmatprep.mubr.msk.f32.mxu0 %vm455_vm1, %v4633_v12 }
  0x88   : > { %3970 = vmatmul.mubr.msk.f32.gmra.mrb[4].mxu0 %vm455_vm1, %v4639_v13 }
  0x89   : > { %3972 = vmatprep.mubr.msk.f32.mxu0 %vm455_vm1, %v927_v24  ;;  %v453_v24 = vld [vmem:[%s5230_s4] sm:$0x3] }
  0x8c   : > { %3973 = vmatmul.mubr.msk.f32.gmra.mrb[6].mxu0 %vm455_vm1, %v1378_v30  ;;  %v3580_v30 = vld [vmem:[%s5232_s6 + $0x30] sm:$0xff] }
  0x8d   : > { %3977 = vmatprep.mubr.msk.f32.mxu0 %vm455_vm1, %v4583_v61 }
  0x90   : > { %3978 = vmatmul.mubr.msk.f32.vlgmr.msra.gmra.mrb[0].mxu0 %vm455_vm1, %v4590_v63 }
  0x91   : > { %3990 = vmatpush3.msk.msra.mxu0 %vm529_vm0, %v3566_v29  ;;  %3980 = vmatprep.mubr.msk.f32.mxu0 %vm455_vm1, %v4594_v0  ;;  %v3579_v29 = vld [vmem:[%s5232_s6 + $0x28] sm:$0xff] }
  0x94   : > { %3981 = vmatmul.mubr.msk.f32.gmra.mrb[2].mxu0 %vm455_vm1, %v4600_v3 }
  0x95   : > { %3983 = vmatprep.mubr.msk.f32.mxu0 %vm455_vm1, %v4602_v2 }
  0x98   : > { %3984 = vmatmul.mubr.msk.f32.gmra.mrb[4].mxu0 %vm455_vm1, %v4608_v4 }
  0x99   : > { %3986 = vmatprep.mubr.msk.f32.mxu0 %vm455_vm1, %v1077_v26 }
  0x9c   : > { %3987 = vmatmul.mubr.msk.f32.gmra.mrb[6].mxu0 %vm455_vm1, %v1528_v31 }
  0x9d   : > { %3991 = vmatprep.mubr.msk.f32.mxu0 %vm455_vm1, %v4644_v16 }
  0xa0   : > { %3992 = vmatmul.mubr.msk.f32.vlgmr.msra.gmra.mrb[0].mxu0 %vm455_vm1, %v4653_v18 }
  0xa1   : > { %3994 = vmatprep.mubr.msk.f32.mxu0 %vm455_vm1, %v4655_v19 }
  0xa4   : > { %3995 = vmatmul.mubr.msk.f32.gmra.mrb[2].mxu0 %vm455_vm1, %v4662_v20 }
  0xa5   : > { %3997 = vmatprep.mubr.msk.f32.mxu0 %vm455_vm1, %v4664_v21 }
  0xa8   : > { %3998 = vmatmul.mubr.msk.f32.gmra.mrb[4].mxu0 %vm455_vm1, %v4670_v22 }
  0xa9   : > { %4000 = vmatprep.mubr.msk.f32.mxu0 %vm455_vm1, %v1227_v28  ;;  %v3578_v28 = vld [vmem:[%s5232_s6 + $0x20] sm:$0xff] }
  0xaa   : > { %v4183_v31 = vpack.c.bf16 %v3579_v29, %v3578_v28 }
  0xac   : > { %4001 = vmatmul.mubr.msk.f32.gmra.mrb[6].mxu0 %vm455_vm1, %v1678_v32  ;;  %v3581_v32 = vld [vmem:[%s5232_s6 + $0x38] sm:$0xff]  ;;  %4184 = vmatprep.subr.bf16.mxu1 %v4183_v31 }
  0xad   : > { %4186 = vmatpush3.bf16.msra.mxu1 %v4183_v31  ;;  %v3623_v31 = vld [vmem:[%s5232_s6 + $0x88] sm:$0xff] }
 0x173   : > { %v3993_v35 = vpop.f32.mrb[0].mxu0 }
 0x174   : > { %v1828_v36 = vmul.f32 %v3993_v35, %v3576_v33  ;;  %v1774_v37 = vpop.f32.mrb[1].mxu0  ;;  %v1950_v35 = vld [vmem:[%s5232_s6] sm:$0xff] }
 0x175   : > { %v1827_v38 = vmul.f32 %v3576_v33, %v1774_v37 }
 0x176   : > { %v4826_v39 = vadd.f32 %v3577_v34, %v1828_v36  ;;  %v1951_v36 = vld [vmem:[%s5232_s6 + $0x8] sm:$0xff] }
 0x177   : > { %v4828_v40 = vadd.f32 %v3577_v34, %v1827_v38  ;;  %v3996_v41 = vpop.f32.mrb[2].mxu0  ;;  %v4191_v37 = vpack.c.bf16 %v1951_v36, %v1950_v35  ;;  %v454_v38 = vld [vmem:[%s5231_s5] sm:$0x3] }
 0x178   : > { %v1850_v42 = vmax.f32 %v4826_v39, 0.0  ;;  %v1830_v1 = vmul.f32 %v3996_v41, %v3576_v33  ;;  %v1784_v43 = vpop.f32.mrb[3].mxu0  ;;  %v1952_v39 = vld [vmem:[%s5232_s6 + $0x10] sm:$0xff] }
 0x179   : > { %v1849_v44 = vmax.f32 %v4828_v40, 0.0  ;;  %v1829_v45 = vmul.f32 %v3576_v33, %v1784_v43  ;;  %v1953_v40 = vld [vmem:[%s5232_s6 + $0x18] sm:$0xff] }
 0x17a   : > { %v4832_v46 = vadd.f32 %v3577_v34, %v1830_v1  ;;  %v1859_v47 = vsel %vm1857_vm3, %v1850_v42, 0.0 }
 0x17b   : > { %v1858_v48 = vsel %vm1857_vm3, %v1849_v44, 0.0  ;;  %v4840_v49 = vadd.f32 %v3577_v34, %v1829_v45  ;;  %v3999_v50 = vpop.f32.mrb[4].mxu0 }
 0x17c   : > { %v1832_v51 = vmul.f32 %v3999_v50, %v3576_v33  ;;  %v1794_v52 = vpop.f32.mrb[5].mxu0  ;;  %v1852_v53 = vmax.f32 %v4832_v46, 0.0  ;;  %v1860_v56 = vadd.f32 %v1859_v47, %v1858_v48 }
 0x17d   : > { %v1851_v54 = vmax.f32 %v4840_v49, 0.0  ;;  %v1831_v55 = vmul.f32 %v3576_v33, %v1794_v52 }
 0x17e   : > { %v4844_v57 = vadd.f32 %v3577_v34, %v1832_v51  ;;  %v1863_v0 = vsel %vm1857_vm3, %v1852_v53, 0.0 }
 0x17f   : > { %v1861_v58 = vsel %vm1857_vm3, %v1851_v54, 0.0  ;;  %v4849_v59 = vadd.f32 %v3577_v34, %v1831_v55  ;;  %v4002_v60 = vpop.f32.mrb[6].mxu0 }
 0x180   : > { %v1862_v61 = vadd.f32 %v1861_v58, %v1860_v56  ;;  %v1834_v62 = vmul.f32 %v4002_v60, %v3576_v33  ;;  %v1804_v63 = vpop.f32.mrb[7].mxu0  ;;  %v1854_v3 = vmax.f32 %v4844_v57, 0.0 }
 0x181   : > { %v1853_v2 = vmax.f32 %v4849_v59, 0.0  ;;  %v1833_v4 = vmul.f32 %v3576_v33, %v1804_v63  ;;  %v1954_v33 = vld [vmem:[#allocation3 + $0x1] sm:$0xff] }
 0x182   : > { %v1864_v5 = vadd.f32 %v1863_v0, %v1862_v61  ;;  %v4856_v6 = vadd.f32 %v3577_v34, %v1834_v62  ;;  %v1867_v10 = vsel %vm1857_vm3, %v1854_v3, 0.0  ;;  %4011 = vmatprep.mubr.msk.f32.mxu1 %vm1857_vm3, %v1954_v33 }
 0x183   : > { %v1865_v7 = vsel %vm1857_vm3, %v1853_v2, 0.0  ;;  %v1847_v8 = vadd.f32 %v3577_v34, %v1833_v4  ;;  %v4187_v34 = vpack.c.bf16 %v3581_v32, %v3580_v30  ;;  %v3622_v30 = vld [vmem:[%s5232_s6 + $0x80] sm:$0xff] }
 0x184   : > { %v1866_v9 = vadd.f32 %v1865_v7, %v1864_v5  ;;  %v1856_v11 = vmax.f32 %v4856_v6, 0.0  ;;  %v4215_v33 = vpack.c.bf16 %v3623_v31, %v3622_v30 }
 0x185   : > { %v1855_v12 = vmax.f32 %v1847_v8, 0.0  ;;  %4188 = vmatprep.subr.bf16.mxu1 %v4187_v34 }
 0x186   : > { %v1868_v13 = vadd.f32 %v1867_v10, %v1866_v9  ;;  %v1871_v16 = vsel %vm1857_vm3, %v1856_v11, 0.0  ;;  %4190 = vmatpush3.bf16.msra.mxu1 %v4187_v34  ;;  %v1942_v10 = vld [vmem:[#allocation3] sm:$0xff] }
 0x187   : > { %v1869_v14 = vsel %vm1857_vm3, %v1855_v12, 0.0  ;;  %4192 = vmatprep.subr.bf16.mxu1 %v4191_v37 }
 0x188   : > { %v1870_v15 = vadd.f32 %v1869_v14, %v1868_v13  ;;  %v3601_v13 = vld [vmem:[%s5232_s6 + $0x58] sm:$0xff] }
 0x18a   : > { %v1872_v17 = vadd.f32 %v1871_v16, %v1870_v15  ;;  %v3610_v16 = vld [vmem:[%s5232_s6 + $0x60] sm:$0xff] }
 0x18c   : > { %v1873_v18 = vrot.slane %v1872_v17, 4 }
 0x18e   : > { %v1874_v19 = vadd.f32 %v1873_v18, %v1872_v17  ;;  %v3611_v17 = vld [vmem:[%s5232_s6 + $0x68] sm:$0xff] }
 0x190   : > { %v1875_v20 = vrot.slane %v1874_v19, 2 }
 0x192   : > { %v1876_v21 = vadd.f32 %v1875_v20, %v1874_v19  ;;  %v4207_v19 = vpack.c.bf16 %v3611_v17, %v3610_v16 }
 0x194   : > { %v1877_v22 = vrot.slane %v1876_v21, 1 }
 0x196   : > { %v1878_v23 = vadd.f32 %v1877_v22, %v1876_v21 }
 0x198   : > { %v1880_v25 = vmul.f32 0.015625, %v1878_v23 }
 0x19a   : > { %v1881_v26 = vmul.f32 %v1880_v25, %v453_v24  ;;  %v2225_v24 = vld [vmem:[#allocation3 + $0x2] sm:$0xff] }
 0x19c   : > { %v1883_v27 = vsel %vm1882_vm4, %v1881_v26, 0.0  ;;  %v3612_v26 = vld [vmem:[%s5232_s6 + $0x70] sm:$0xff] }
 0x19d   : > { %1884 = vadd.xlane.f32.xlu0 %v1883_v27  ;;  %v3613_v27 = vld [vmem:[%s5232_s6 + $0x78] sm:$0xff] }
 0x19e   : > { %v4211_v28 = vpack.c.bf16 %v3613_v27, %v3612_v26 }
 0x22a   : > { %v1885_v41 = vpop.xlane.xlu0 %1884 }
 0x22b   : > { %v1886_v1 = vmax.f32 %v1885_v41, 0.0  ;;  %v3624_v41 = vld [vmem:[%s5232_s6 + $0x90] sm:$0xff] }
 0x22d   : > { %v1887_v43 = vmul.f32 %v1886_v1, %v454_v38  ;;  %v3625_v1 = vld [vmem:[%s5232_s6 + $0x98] sm:$0xff] }
 0x22f   : > { %v1888_v45 = vsel %vm1882_vm4, %v1887_v43, 0.0  ;;  %v4219_v43 = vpack.c.bf16 %v3625_v1, %v3624_v41 }
 0x230   : > { %v1889_v47 = vrot.slane %v1888_v45, 4 }
 0x232   : > { %v1890_v48 = vadd.f32 %v1889_v47, %v1888_v45  ;;  %v3634_v45 = vld [vmem:[%s5232_s6 + $0xa0] sm:$0xff]  ;;  %v3635_v47 = vld [vmem:[%s5232_s6 + $0xa8] sm:$0xff] }
 0x234   : > { %v1891_v50 = vrot.slane %v1890_v48, 2 }
 0x236   : > { %v1892_v51 = vadd.f32 %v1891_v50, %v1890_v48  ;;  %v4223_v48 = vpack.c.bf16 %v3635_v47, %v3634_v45 }
 0x238   : > { %v1893_v52 = vrot.slane %v1892_v51, 1 }
 0x23a   : > { %v1894_v55 = vadd.f32 %v1893_v52, %v1892_v51  ;;  %v3636_v51 = vld [vmem:[%s5232_s6 + $0xb0] sm:$0xff]  ;;  %v3637_v52 = vld [vmem:[%s5232_s6 + $0xb8] sm:$0xff] }
 0x23c   : > { %v1895_v56 = vsub.f32 0.0, %v1894_v55  ;;  %v4227_v55 = vpack.c.bf16 %v3637_v52, %v3636_v51 }
 0x23e   : > { %v1896_v58 = vmul.f32 1.442695, %v1895_v56  ;;  %v3646_v56 = vld [vmem:[%s5232_s6 + $0xc0] sm:$0xff] }
 0x240   : > { %4392 = vpow2.f32 %v1896_v58  ;;  %v3647_v58 = vld [vmem:[%s5232_s6 + $0xc8] sm:$0xff] }
 0x24a   : > { %v4393_v60 = vpop.eup %4392 }
 0x24b   : > { %v1898_v61 = vadd.f32 1.0, %v4393_v60  ;;  %v4231_v60 = vpack.c.bf16 %v3647_v58, %v3646_v56 }
 0x24d   : > { %4394 = vrcp.f32 %v1898_v61 }
 0x257   : > { %v4395_v62 = vpop.eup %4394 }
 0x258   : > { %v1901_v63 = vmul.f32 %v4395_v62, %v1849_v44  ;;  %v1902_v0 = vmul.f32 %v4395_v62, %v1850_v42  ;;  %v1903_v4 = vmul.f32 %v4395_v62, %v1851_v54  ;;  %v1904_v5 = vmul.f32 %v4395_v62, %v1852_v53  ;;  %v3598_v44 = vld [vmem:[%s5232_s6 + $0x40] sm:$0xff]  ;;  %v3599_v53 = vld [vmem:[%s5232_s6 + $0x48] sm:$0xff] }
 0x259   : > { %v1905_v6 = vmul.f32 %v4395_v62, %v1853_v2  ;;  %v1906_v7 = vmul.f32 %v4395_v62, %v1854_v3  ;;  %v1907_v8 = vmul.f32 %v4395_v62, %v1855_v12  ;;  %v1908_v9 = vmul.f32 %v4395_v62, %v1856_v11  ;;  %v3600_v12 = vld [vmem:[%s5232_s6 + $0x50] sm:$0xff] }
 0x25a   : > { %1934 = vst.msk [vmem:[#allocation3 + $0x11] sm:$0xff] %vm1857_vm3, %v1901_v63  ;;  %1935 = vst.msk [vmem:[#allocation3 + $0x21] sm:$0xff] %vm1857_vm3, %v1902_v0  ;;  %v4195_v42 = vpack.c.bf16 %v1953_v40, %v1952_v39  ;;  %v4199_v54 = vpack.c.bf16 %v3599_v53, %v3598_v44  ;;  %v4203_v14 = vpack.c.bf16 %v3601_v13, %v3600_v12  ;;  %v3648_v62 = vld [vmem:[%s5232_s6 + $0xd0] sm:$0xff]  ;;  %v3649_v63 = vld [vmem:[%s5232_s6 + $0xd8] sm:$0xff] }
 0x25b   : > { %1936 = vst.msk [vmem:[#allocation3 + $0x31] sm:$0xff] %vm1857_vm3, %v1903_v4  ;;  %1937 = vst.msk [vmem:[#allocation3 + $0x41] sm:$0xff] %vm1857_vm3, %v1904_v5  ;;  %v4235_v0 = vpack.c.bf16 %v3649_v63, %v3648_v62  ;;  %v3658_v4 = vld [vmem:[%s5232_s6 + $0xe0] sm:$0xff]  ;;  %v3659_v5 = vld [vmem:[%s5232_s6 + $0xe8] sm:$0xff] }
 0x25c   : > { %1938 = vst.msk [vmem:[#allocation3 + $0x51] sm:$0xff] %vm1857_vm3, %v1905_v6  ;;  %1939 = vst.msk [vmem:[#allocation3 + $0x61] sm:$0xff] %vm1857_vm3, %v1906_v7  ;;  %v4239_v6 = vpack.c.bf16 %v3659_v5, %v3658_v4  ;;  %v3670_v40 = vld [vmem:[%s5232_s6 + $0x100] sm:$0xff]  ;;  %v3672_v53 = vld [vmem:[%s5232_s6 + $0x110] sm:$0xff] }
 0x25d   : > { %1940 = vst.msk [vmem:[#allocation3 + $0x71] sm:$0xff] %vm1857_vm3, %v1907_v8  ;;  %1941 = vst.msk [vmem:[#allocation3 + $0x81] sm:$0xff] %vm1857_vm3, %v1908_v9  ;;  %v3660_v8 = vld [vmem:[%s5232_s6 + $0xf0] sm:$0xff]  ;;  %v3661_v9 = vld [vmem:[%s5232_s6 + $0xf8] sm:$0xff] }
 0x25e   : > { %v4243_v39 = vpack.c.bf16 %v3661_v9, %v3660_v8 }
 0x261   : > { %v4923_v46 = vld [vmem:[#allocation3 + $0x11] sm:$0xff]  ;;  %v4925_v49 = vld [vmem:[#allocation3 + $0x21] sm:$0xff] }
 0x262   : > { %4012 = vmatmul.mubr.msk.f32.vlgmr.msra.gmra.mrb[0].mxu1 %vm1857_vm3, %v4923_v46  ;;  %v4934_v57 = vld [vmem:[#allocation3 + $0x31] sm:$0xff]  ;;  %v4938_v59 = vld [vmem:[#allocation3 + $0x41] sm:$0xff] }
 0x263   : > { %4194 = vmatpush3.bf16.msra.mxu1 %v4191_v37  ;;  %4014 = vmatprep.mubr.msk.f32.mxu1 %vm1857_vm3, %v4925_v49  ;;  %v4942_v3 = vld [vmem:[#allocation3 + $0x51] sm:$0xff]  ;;  %v4946_v2 = vld [vmem:[#allocation3 + $0x61] sm:$0xff] }
 0x264   : > { %4196 = vmatprep.subr.bf16.mxu1 %v4195_v42  ;;  %v4950_v11 = vld [vmem:[#allocation3 + $0x71] sm:$0xff]  ;;  %v4968_v18 = vld [vmem:[#allocation3 + $0x20] sm:$0xff] }
 0x265   : > { %v1943_v15 = vld [vmem:[#allocation3 + $0x10] sm:$0xff]  ;;  %v4976_v21 = vld [vmem:[#allocation3 + $0x40] sm:$0xff] }
 0x266   : > { %4015 = vmatmul.mubr.msk.f32.gmra.mrb[2].mxu1 %vm1857_vm3, %v4934_v57  ;;  %v4972_v20 = vld [vmem:[#allocation3 + $0x30] sm:$0xff]  ;;  %v4984_v23 = vld [vmem:[#allocation3 + $0x60] sm:$0xff] }
 0x267   : > { %4017 = vmatprep.mubr.msk.f32.mxu1 %vm1857_vm3, %v4938_v59  ;;  %4198 = vmatpush3.bf16.msra.mxu1 %v4195_v42  ;;  %v4980_v22 = vld [vmem:[#allocation3 + $0x50] sm:$0xff]  ;;  %v5006_v32 = vld [vmem:[#allocation3 + $0x22] sm:$0xff] }
 0x268   : > { %4200 = vmatprep.subr.bf16.mxu1 %v4199_v54  ;;  %v4988_v25 = vld [vmem:[#allocation3 + $0x70] sm:$0xff]  ;;  %v5014_v35 = vld [vmem:[#allocation3 + $0x42] sm:$0xff] }
 0x269   : > { %v2226_v29 = vld [vmem:[#allocation3 + $0x12] sm:$0xff]  ;;  %v5022_v37 = vld [vmem:[#allocation3 + $0x62] sm:$0xff] }
 0x26a   : > { %4018 = vmatmul.mubr.msk.f32.gmra.mrb[4].mxu1 %vm1857_vm3, %v4942_v3  ;;  %v5010_v34 = vld [vmem:[#allocation3 + $0x32] sm:$0xff]  ;;  %v2382_v50 = vld [vmem:[#allocation3 + $0x80] sm:$0xff]  ;;  %v3671_v42 = vld [vmem:[%s5232_s6 + $0x108] sm:$0xff] }
 0x26b   : > { %4020 = vmatprep.mubr.msk.f32.mxu1 %vm1857_vm3, %v4946_v2  ;;  %v5018_v36 = vld [vmem:[#allocation3 + $0x52] sm:$0xff]  ;;  %v2532_v61 = vld [vmem:[#allocation3 + $0x81] sm:$0xff]  ;;  %v4247_v44 = vpack.c.bf16 %v3671_v42, %v3670_v40 }
 0x26c   : > { %v5026_v38 = vld [vmem:[#allocation3 + $0x72] sm:$0xff]  ;;  %v2682_v7 = vld [vmem:[#allocation3 + $0x82] sm:$0xff]  ;;  %v1911_v40 = vld [vmem:[%s5235_s9] sm:$0x3] }
 0x26e   : > { %4021 = vmatmul.mubr.msk.f32.gmra.mrb[6].mxu1 %vm1857_vm3, %v4950_v11 }
 0x26f   : > { %4031 = vmatprep.mubr.msk.f32.mxu1 %vm1857_vm3, %v1942_v10 }
 0x272   : > { %4032 = vmatmul.mubr.msk.f32.vlgmr.msra.gmra.mrb[0].mxu1 %vm1857_vm3, %v1943_v15 }
 0x273   : > { %4202 = vmatpush3.bf16.msra.mxu1 %v4199_v54  ;;  %4034 = vmatprep.mubr.msk.f32.mxu1 %vm1857_vm3, %v4968_v18  ;;  %v3673_v54 = vld [vmem:[%s5232_s6 + $0x118] sm:$0xff] }
 0x274   : > { %4204 = vmatprep.subr.bf16.mxu1 %v4203_v14  ;;  %v4251_v10 = vpack.c.bf16 %v3673_v54, %v3672_v53  ;;  %v1912_v53 = vld [vmem:[%s5236_s10] sm:$0x3] }
 0x276   : > { %4035 = vmatmul.mubr.msk.f32.gmra.mrb[2].mxu1 %vm1857_vm3, %v4972_v20 }
 0x277   : > { %4037 = vmatprep.mubr.msk.f32.mxu1 %vm1857_vm3, %v4976_v21  ;;  %4206 = vmatpush3.bf16.msra.mxu1 %v4203_v14 }
 0x278   : > { %4208 = vmatprep.subr.bf16.mxu1 %v4207_v19 }
 0x27a   : > { %4038 = vmatmul.mubr.msk.f32.gmra.mrb[4].mxu1 %vm1857_vm3, %v4980_v22 }
 0x27b   : > { %4040 = vmatprep.mubr.msk.f32.mxu1 %vm1857_vm3, %v4984_v23 }
 0x27e   : > { %4041 = vmatmul.mubr.msk.f32.gmra.mrb[6].mxu1 %vm1857_vm3, %v4988_v25 }
 0x27f   : > { %4051 = vmatprep.mubr.msk.f32.mxu1 %vm1857_vm3, %v2225_v24 }
 0x282   : > { %4052 = vmatmul.mubr.msk.f32.vlgmr.msra.gmra.mrb[0].mxu1 %vm1857_vm3, %v2226_v29 }
 0x283   : > { %4210 = vmatpush3.bf16.msra.mxu1 %v4207_v19  ;;  %4054 = vmatprep.mubr.msk.f32.mxu1 %vm1857_vm3, %v5006_v32 }
 0x284   : > { %4212 = vmatprep.subr.bf16.mxu1 %v4211_v28 }
 0x286   : > { %4055 = vmatmul.mubr.msk.f32.gmra.mrb[2].mxu1 %vm1857_vm3, %v5010_v34 }
 0x287   : > { %4057 = vmatprep.mubr.msk.f32.mxu1 %vm1857_vm3, %v5014_v35  ;;  %4214 = vmatpush3.bf16.msra.mxu1 %v4211_v28 }
 0x288   : > { %4216 = vmatprep.subr.bf16.mxu1 %v4215_v33 }
 0x28a   : > { %4058 = vmatmul.mubr.msk.f32.gmra.mrb[4].mxu1 %vm1857_vm3, %v5018_v36 }
 0x28b   : > { %4060 = vmatprep.mubr.msk.f32.mxu1 %vm1857_vm3, %v5022_v37 }
 0x28e   : > { %4061 = vmatmul.mubr.msk.f32.gmra.mrb[6].mxu1 %vm1857_vm3, %v5026_v38 }
 0x28f   : > { %4071 = vmatprep.mubr.msk.f32.mxu1 %vm1857_vm3, %v1943_v15 }
 0x292   : > { %4072 = vmatmul.mubr.msk.f32.vlgmr.msra.gmra.mrb[0].mxu1 %vm1857_vm3, %v4968_v18 }
 0x293   : > { %4218 = vmatpush3.bf16.msra.mxu1 %v4215_v33  ;;  %4074 = vmatprep.mubr.msk.f32.mxu1 %vm1857_vm3, %v4972_v20 }
 0x294   : > { %4220 = vmatprep.subr.bf16.mxu1 %v4219_v43 }
 0x296   : > { %4075 = vmatmul.mubr.msk.f32.gmra.mrb[2].mxu1 %vm1857_vm3, %v4976_v21 }
 0x297   : > { %4077 = vmatprep.mubr.msk.f32.mxu1 %vm1857_vm3, %v4980_v22  ;;  %4222 = vmatpush3.bf16.msra.mxu1 %v4219_v43 }
 0x298   : > { %4224 = vmatprep.subr.bf16.mxu1 %v4223_v48 }
 0x29a   : > { %4078 = vmatmul.mubr.msk.f32.gmra.mrb[4].mxu1 %vm1857_vm3, %v4984_v23 }
 0x29b   : > { %4080 = vmatprep.mubr.msk.f32.mxu1 %vm1857_vm3, %v4988_v25 }
 0x29e   : > { %4081 = vmatmul.mubr.msk.f32.gmra.mrb[6].mxu1 %vm1857_vm3, %v2382_v50 }
 0x29f   : > { %4091 = vmatprep.mubr.msk.f32.mxu1 %vm1857_vm3, %v4923_v46  ;;  %v2833_v46 = vld [vmem:[#allocation3 + $0x90] sm:$0xff] }
 0x2a2   : > { %4092 = vmatmul.mubr.msk.f32.vlgmr.msra.gmra.mrb[0].mxu1 %vm1857_vm3, %v4925_v49 }
 0x2a3   : > { %4226 = vmatpush3.bf16.msra.mxu1 %v4223_v48  ;;  %4094 = vmatprep.mubr.msk.f32.mxu1 %vm1857_vm3, %v4934_v57 }
 0x2a4   : > { %4228 = vmatprep.subr.bf16.mxu1 %v4227_v55 }
 0x2a6   : > { %4095 = vmatmul.mubr.msk.f32.gmra.mrb[2].mxu1 %vm1857_vm3, %v4938_v59 }
 0x2a7   : > { %4097 = vmatprep.mubr.msk.f32.mxu1 %vm1857_vm3, %v4942_v3  ;;  %4230 = vmatpush3.bf16.msra.mxu1 %v4227_v55 }
 0x2a8   : > { %4232 = vmatprep.subr.bf16.mxu1 %v4231_v60 }
 0x2aa   : > { %4098 = vmatmul.mubr.msk.f32.gmra.mrb[4].mxu1 %vm1857_vm3, %v4946_v2 }
 0x2ab   : > { %4100 = vmatprep.mubr.msk.f32.mxu1 %vm1857_vm3, %v4950_v11 }
 0x2ae   : > { %4101 = vmatmul.mubr.msk.f32.gmra.mrb[6].mxu1 %vm1857_vm3, %v2532_v61 }
 0x2af   : > { %4111 = vmatprep.mubr.msk.f32.mxu1 %vm1857_vm3, %v2226_v29 }
 0x2b2   : > { %4112 = vmatmul.mubr.msk.f32.vlgmr.msra.gmra.mrb[0].mxu1 %vm1857_vm3, %v5006_v32 }
 0x2b3   : > { %4234 = vmatpush3.bf16.msra.mxu1 %v4231_v60  ;;  %4114 = vmatprep.mubr.msk.f32.mxu1 %vm1857_vm3, %v5010_v34 }
 0x2b4   : > { %4236 = vmatprep.subr.bf16.mxu1 %v4235_v0 }
 0x2b6   : > { %4115 = vmatmul.mubr.msk.f32.gmra.mrb[2].mxu1 %vm1857_vm3, %v5014_v35 }
 0x2b7   : > { %4117 = vmatprep.mubr.msk.f32.mxu1 %vm1857_vm3, %v5018_v36  ;;  %4238 = vmatpush3.bf16.msra.mxu1 %v4235_v0 }
 0x2b8   : > { %4240 = vmatprep.subr.bf16.mxu1 %v4239_v6 }
 0x2ba   : > { %4118 = vmatmul.mubr.msk.f32.gmra.mrb[4].mxu1 %vm1857_vm3, %v5022_v37 }
 0x2bb   : > { %4120 = vmatprep.mubr.msk.f32.mxu1 %vm1857_vm3, %v5026_v38 }
 0x2be   : > { %4121 = vmatmul.mubr.msk.f32.gmra.mrb[6].mxu1 %vm1857_vm3, %v2682_v7 }
 0x2bf   : > { %4131 = vmatprep.mubr.msk.f32.mxu1 %vm1857_vm3, %v4968_v18 }
 0x2c2   : > { %4132 = vmatmul.mubr.msk.f32.vlgmr.msra.gmra.mrb[0].mxu1 %vm1857_vm3, %v4972_v20 }
 0x2c3   : > { %4242 = vmatpush3.bf16.msra.mxu1 %v4239_v6  ;;  %4134 = vmatprep.mubr.msk.f32.mxu1 %vm1857_vm3, %v4976_v21 }
 0x2c4   : > { %4244 = vmatprep.subr.bf16.mxu1 %v4243_v39 }
 0x2c6   : > { %4135 = vmatmul.mubr.msk.f32.gmra.mrb[2].mxu1 %vm1857_vm3, %v4980_v22 }
 0x2c7   : > { %4137 = vmatprep.mubr.msk.f32.mxu1 %vm1857_vm3, %v4984_v23  ;;  %4246 = vmatpush3.bf16.msra.mxu1 %v4243_v39 }
 0x2c8   : > { %4248 = vmatprep.subr.bf16.mxu1 %v4247_v44 }
 0x2ca   : > { %4138 = vmatmul.mubr.msk.f32.gmra.mrb[4].mxu1 %vm1857_vm3, %v4988_v25 }
 0x2cb   : > { %4140 = vmatprep.mubr.msk.f32.mxu1 %vm1857_vm3, %v2382_v50 }
 0x2ce   : > { %4141 = vmatmul.mubr.msk.f32.gmra.mrb[6].mxu1 %vm1857_vm3, %v2833_v46 }
 0x2cf   : > { %4151 = vmatprep.mubr.msk.f32.mxu1 %vm1857_vm3, %v4925_v49  ;;  %v2983_v49 = vld [vmem:[#allocation3 + $0x91] sm:$0xff] }
 0x2d2   : > { %4152 = vmatmul.mubr.msk.f32.vlgmr.msra.gmra.mrb[0].mxu1 %vm1857_vm3, %v4934_v57  ;;  %v3133_v57 = vld [vmem:[#allocation3 + $0x92] sm:$0xff] }
 0x2d3   : > { %4250 = vmatpush3.bf16.msra.mxu1 %v4247_v44  ;;  %4154 = vmatprep.mubr.msk.f32.mxu1 %vm1857_vm3, %v4938_v59  ;;  %v3682_v59 = vld [vmem:[%s5233_s7] ss:$0 sm:$0xff] }
 0x2d4   : > { %4252 = vmatprep.subr.bf16.mxu1 %v4251_v10 }
 0x2d6   : > { %4155 = vmatmul.mubr.msk.f32.gmra.mrb[2].mxu1 %vm1857_vm3, %v4942_v3  ;;  %v3683_v3 = vld [vmem:[%s5234_s8] ss:$0 sm:$0xff] }
 0x2d7   : > { %4157 = vmatprep.mubr.msk.f32.mxu1 %vm1857_vm3, %v4946_v2  ;;  %4254 = vmatpush3.bf16.msra.mxu1 %v4251_v10 }
 0x2da   : > { %4158 = vmatmul.mubr.msk.f32.gmra.mrb[4].mxu1 %vm1857_vm3, %v4950_v11 }
 0x2db   : > { %4160 = vmatprep.mubr.msk.f32.mxu1 %vm1857_vm3, %v2532_v61 }
 0x2de   : > { %4161 = vmatmul.mubr.msk.f32.gmra.mrb[6].mxu1 %vm1857_vm3, %v2983_v49 }
 0x2df   : > { %4171 = vmatprep.mubr.msk.f32.mxu1 %vm1857_vm3, %v5006_v32 }
 0x2e2   : > { %4172 = vmatmul.mubr.msk.f32.vlgmr.msra.gmra.mrb[0].mxu1 %vm1857_vm3, %v5010_v34 }
 0x2e3   : > { %4174 = vmatprep.mubr.msk.f32.mxu1 %vm1857_vm3, %v5014_v35 }
 0x2e6   : > { %4175 = vmatmul.mubr.msk.f32.gmra.mrb[2].mxu1 %vm1857_vm3, %v5018_v36 }
 0x2e7   : > { %4177 = vmatprep.mubr.msk.f32.mxu1 %vm1857_vm3, %v5022_v37 }
 0x2ea   : > { %4178 = vmatmul.mubr.msk.f32.gmra.mrb[4].mxu1 %vm1857_vm3, %v5026_v38 }
 0x2eb   : > { %4180 = vmatprep.mubr.msk.f32.mxu1 %vm1857_vm3, %v2682_v7 }
 0x2ee   : > { %4181 = vmatmul.mubr.msk.f32.gmra.mrb[6].mxu1 %vm1857_vm3, %v3133_v57 }
 0x3b5   : > { %v4173_v2 = vpop.f32.mrb[0].mxu1 }
 0x3b6   : > { %v3283_v11 = vmul.f32 %v4173_v2, %v3682_v59  ;;  %v3229_v12 = vpop.f32.mrb[1].mxu1 }
 0x3b7   : > { %v3282_v13 = vmul.f32 %v3682_v59, %v3229_v12 }
 0x3b8   : > { %v5175_v14 = vadd.f32 %v3683_v3, %v3283_v11 }
 0x3b9   : > { %v5177_v15 = vadd.f32 %v3683_v3, %v3282_v13  ;;  %v4176_v16 = vpop.f32.mrb[2].mxu1 }
 0x3ba   : > { %v3305_v17 = vmax.f32 %v5175_v14, 0.0  ;;  %v3285_v18 = vmul.f32 %v4176_v16, %v3682_v59  ;;  %v3239_v19 = vpop.f32.mrb[3].mxu1 }
 0x3bb   : > { %v3304_v20 = vmax.f32 %v5177_v15, 0.0  ;;  %v3284_v21 = vmul.f32 %v3682_v59, %v3239_v19 }
 0x3bc   : > { %v5181_v22 = vadd.f32 %v3683_v3, %v3285_v18  ;;  %v3313_v23 = vsel %vm1857_vm3, %v3305_v17, 0.0 }
 0x3bd   : > { %v3312_v24 = vsel %vm1857_vm3, %v3304_v20, 0.0  ;;  %v5189_v25 = vadd.f32 %v3683_v3, %v3284_v21  ;;  %v4179_v26 = vpop.f32.mrb[4].mxu1 }
 0x3be   : > { %v3287_v27 = vmul.f32 %v4179_v26, %v3682_v59  ;;  %v3249_v28 = vpop.f32.mrb[5].mxu1  ;;  %v3307_v29 = vmax.f32 %v5181_v22, 0.0  ;;  %v3314_v32 = vadd.f32 %v3313_v23, %v3312_v24 }
 0x3bf   : > { %v3306_v30 = vmax.f32 %v5189_v25, 0.0  ;;  %v3286_v31 = vmul.f32 %v3682_v59, %v3249_v28 }
 0x3c0   : > { %v5193_v33 = vadd.f32 %v3683_v3, %v3287_v27  ;;  %v3317_v1 = vsel %vm1857_vm3, %v3307_v29, 0.0 }
 0x3c1   : > { %v3315_v34 = vsel %vm1857_vm3, %v3306_v30, 0.0  ;;  %v3300_v35 = vadd.f32 %v3683_v3, %v3286_v31  ;;  %v4182_v36 = vpop.f32.mrb[6].mxu1 }
 0x3c2   : > { %v3316_v37 = vadd.f32 %v3315_v34, %v3314_v32  ;;  %v3289_v38 = vmul.f32 %v4182_v36, %v3682_v59  ;;  %v3259_v41 = vpop.f32.mrb[7].mxu1  ;;  %v3309_v43 = vmax.f32 %v5193_v33, 0.0 }
 0x3c3   : > { %v3308_v45 = vmax.f32 %v3300_v35, 0.0  ;;  %v3288_v47 = vmul.f32 %v3682_v59, %v3259_v41 }
 0x3c4   : > { %v3318_v48 = vadd.f32 %v3317_v1, %v3316_v37  ;;  %v3303_v50 = vadd.f32 %v3683_v3, %v3289_v38  ;;  %v3321_v56 = vsel %vm1857_vm3, %v3309_v43, 0.0 }
 0x3c5   : > { %v3319_v51 = vsel %vm1857_vm3, %v3308_v45, 0.0  ;;  %v3302_v52 = vadd.f32 %v3683_v3, %v3288_v47 }
 0x3c6   : > { %v3320_v55 = vadd.f32 %v3319_v51, %v3318_v48  ;;  %v3311_v58 = vmax.f32 %v3303_v50, 0.0 }
 0x3c7   : > { %v3310_v60 = vmax.f32 %v3302_v52, 0.0 }
 0x3c8   : > { %v3322_v61 = vadd.f32 %v3321_v56, %v3320_v55  ;;  %v3325_v0 = vsel %vm1857_vm3, %v3311_v58, 0.0 }
 0x3c9   : > { %v3323_v62 = vsel %vm1857_vm3, %v3310_v60, 0.0 }
 0x3ca   : > { %v3324_v63 = vadd.f32 %v3323_v62, %v3322_v61 }
 0x3cc   : > { %v3326_v4 = vadd.f32 %v3325_v0, %v3324_v63 }
 0x3ce   : > { %v3327_v5 = vrot.slane %v3326_v4, 4 }
 0x3d0   : > { %v3328_v6 = vadd.f32 %v3327_v5, %v3326_v4 }
 0x3d2   : > { %v3329_v7 = vrot.slane %v3328_v6, 2 }
 0x3d4   : > { %v3330_v8 = vadd.f32 %v3329_v7, %v3328_v6 }
 0x3d6   : > { %v3331_v9 = vrot.slane %v3330_v8, 1 }
 0x3d8   : > { %v3332_v39 = vadd.f32 %v3331_v9, %v3330_v8 }
 0x3da   : > { %v3333_v42 = vmul.f32 0.015625, %v3332_v39 }
 0x3dc   : > { %v3334_v44 = vmul.f32 %v3333_v42, %v1911_v40 }
 0x3de   : > { %v3335_v46 = vsel %vm1882_vm4, %v3334_v44, 0.0 }
 0x3df   : > { %3336 = vadd.xlane.f32.xlu0 %v3335_v46 }
 0x46c   : > { %v3337_v54 = vpop.xlane.xlu0 %3336 }
 0x46d   : > { %v3338_v10 = vmax.f32 %v3337_v54, 0.0 }
 0x46f   : > { %v3339_v49 = vmul.f32 %v3338_v10, %v1912_v53 }
 0x471   : > { %v3340_v57 = vsel %vm1882_vm4, %v3339_v49, 0.0 }
 0x472   : > { %v3341_v59 = vrot.slane %v3340_v57, 4 }
 0x474   : > { %v3342_v3 = vadd.f32 %v3341_v59, %v3340_v57 }
 0x476   : > { %v3343_v2 = vrot.slane %v3342_v3, 2 }
 0x478   : > { %v3344_v11 = vadd.f32 %v3343_v2, %v3342_v3 }
 0x47a   : > { %v3345_v12 = vrot.slane %v3344_v11, 1 }
 0x47c   : > { %v3346_v13 = vadd.f32 %v3345_v12, %v3344_v11 }
 0x47e   : > { %v3347_v16 = vsub.f32 0.0, %v3346_v13 }
 0x480   : > { %v3348_v18 = vmul.f32 1.442695, %v3347_v16 }
 0x482   : > { %4396 = vpow2.f32 %v3348_v18 }
 0x48c   : > { %v4397_v19 = vpop.eup %4396 }
 0x48d   : > { %v3350_v21 = vadd.f32 1.0, %v4397_v19 }
 0x48f   : > { %4398 = vrcp.f32 %v3350_v21 }
 0x499   : > { %v4399_v23 = vpop.eup %4398 }
 0x49a   : > { %v3353_v24 = vmul.f32 %v4399_v23, %v3304_v20  ;;  %v3354_v25 = vmul.f32 %v4399_v23, %v3305_v17  ;;  %v3355_v26 = vmul.f32 %v4399_v23, %v3306_v30  ;;  %v3356_v27 = vmul.f32 %v4399_v23, %v3307_v29 }
 0x49b   : > { %v3357_v28 = vmul.f32 %v4399_v23, %v3308_v45  ;;  %v3358_v31 = vmul.f32 %v4399_v23, %v3309_v43  ;;  %v3359_v32 = vmul.f32 %v4399_v23, %v3310_v60  ;;  %v3360_v15 = vmul.f32 %v4399_v23, %v3311_v58 }
 0x49c   : > { %3361 = vxpose.xlu1.b32.start [1/8] (short) (narrow) %v3353_v24, 32 }
 0x4a0   : > { %3362 = vxpose.xlu1.b32.cont [2/8] (short) (narrow) %v3354_v25, 32 }
 0x4a4   : > { %3363 = vxpose.xlu1.b32.cont [3/8] (short) (narrow) %v3355_v26, 32 }
 0x4a8   : > { %3364 = vxpose.xlu1.b32.cont [4/8] (short) (narrow) %v3356_v27, 32 }
 0x4ac   : > { %3365 = vxpose.xlu1.b32.cont [5/8] (short) (narrow) %v3357_v28, 32 }
 0x4b0   : > { %3366 = vxpose.xlu1.b32.cont [6/8] (short) (narrow) %v3358_v31, 32 }
 0x4b4   : > { %3367 = vxpose.xlu1.b32.cont [7/8] (short) (narrow) %v3359_v32, 32 }
 0x4b8   : > { %3368 = vxpose.xlu1.b32.end [8/8] (short) (narrow) %v3360_v15, 32 }
 0x51c   : > { %v3377_v14 = vpop.trf.xlu1 }
 0x51d   : > { %3394 = vst.msk [vmem:[%s391_s12] sm:$0xff] %vm3393_vm5, %v3377_v14 }
 0x520   : > { %v3378_v17 = vpop.trf.xlu1 }
 0x521   : > { %3395 = vst.msk [vmem:[%s391_s12 + $0x8] sm:$0xff] %vm3393_vm5, %v3378_v17 }
 0x524   : > { %v3379_v20 = vpop.trf.xlu1 }
 0x525   : > { %3396 = vst.msk [vmem:[%s391_s12 + $0x10] sm:$0xff] %vm3393_vm5, %v3379_v20 }
 0x528   : > { %v3380_v22 = vpop.trf.xlu1 }
 0x529   : > { %3397 = vst.msk [vmem:[%s391_s12 + $0x18] sm:$0xff] %vm3393_vm5, %v3380_v22 }
 0x52a PF: > { %s21_s17 = sadd.s32 1, %s4406_s17  }
 0x52b   : > { %p18_p5 = scmp.ge.s32.totalorder %s21_s17, 4  }
 0x52d   :  { %20 = sbr.rel (!%p18_p5) target bundleno = 1 (0x1), region = 117 }

</bundles_post_ra>
